<compile_context>
chip_gen: v7x
topology: tpu7x:2x2x1
jax: 0.10.0
libtpu: 0.0.40
codegen_flags: <defaults>
</compile_context>

<pallas_src>
import functools

import jax
import jax.numpy as jnp
from jax.experimental import pallas as pl
from jax.experimental.pallas import tpu as pltpu


# ---------------------------------------------------------------------------
# Pallas kernel: the entire SAGE_edge2 forward pass on one VMEM-resident graph.
# ---------------------------------------------------------------------------
def sage_edge2_kernel(
    # data
    x_ref,        # [N, C]   f32  node features (ResNet fc output stand-in)
    gsrc_ref,     # [E, N]   bf16 one-hot(src)            (message gather)
    g2_ref,       # [E, 2N]  bf16 [one-hot(src)|one-hot(dst)] (edge-score gather)
    ssum_ref,     # [N, E]   bf16 one-hot(dst)^T          (scatter-sum)
    invdeg_ref,   # [N, 1]   f32  1 / max(in_degree, 1)
    ea_ref,       # [E, 1]   f32  edge attributes
    noise_ref,    # [E, 1]   f32  uniform(1e-10, 1-1e-10)
    # parameters (pre-transposed [fan_in, fan_out]; biases [1, fan_out])
    w_pre, b_pre,
    we1, be1, wcat1, bl1,
    w_hh1, b_hh1,
    we2, be2, wcat2, bl2,
    w_hh2, b_hh2,
    we3, be3, wcat3, bl3,
    w_oo, b_oo,
    w_ohbn, b_ohbn,          # lin_oh with BatchNorm1d (eval) folded in
    w_pin, w_pout, b_post,   # postlin split into per-endpoint [H,1] columns
    out_ref,
    *, n_groups,
):
    f32 = jnp.float32
    bf16 = jnp.bfloat16

    def dot(a, b):
        return jnp.dot(a, b, preferred_element_type=f32)

    def lrelu(v):  # LeakyReLU default negative_slope = 0.01
        return jnp.where(v >= 0, v, 0.01 * v)

    gsrc = gsrc_ref[...]      # bf16 [E, N]
    ssum = ssum_ref[...]      # bf16 [N, E]
    inv_deg = invdeg_ref[...]  # f32 [N, 1]
    ea = ea_ref[...]          # f32 [E, 1]

    # prelin + relu
    x = dot(x_ref[...], w_pre[...]) + b_pre[...]
    x = jnp.maximum(x, 0.0)

    # SAGEConv_edge:
    #   msg  = relu(x[src] + lin_e(edge_attr))
    #   aggr = mean over dst
    #   out  = lin_l(aggr) + lin_r(x)   (fused via w_cat = [wl; wr] on concat([aggr, x]))
    def sage_conv(x, we_row, be, w_cat, bl):
        xb = x.astype(bf16)
        x_j = dot(gsrc, xb)                              # [E, Hin] bf16 MXU, f32 acc
        e_feat = ea * we_row[...] + be[...]              # lin_e as VPU broadcast (K == 1)
        msg = jnp.maximum(x_j + e_feat, 0.0)             # relu message, f32
        agg = dot(ssum, msg.astype(bf16)) * inv_deg      # scatter-sum (bf16) * 1/deg (f32)
        h = jnp.concatenate([agg, x], axis=-1)           # [N, 2*Hin]
        return dot(h, w_cat[...]) + bl[...]              # fused lin_l | lin_r

    x = jnp.maximum(sage_conv(x, we1, be1, wcat1, bl1), 0.0)
    x = lrelu(dot(x, w_hh1[...]) + b_hh1[...])

    x = jnp.maximum(sage_conv(x, we2, be2, wcat2, bl2), 0.0)
    x = lrelu(dot(x, w_hh2[...]) + b_hh2[...])

    x = jnp.maximum(sage_conv(x, we3, be3, wcat3, bl3), 0.0)
    x = lrelu(dot(x, w_oo[...]) + b_oo[...])

    # lin_oh with BatchNorm1d (eval mode, running mean=0 var=1) folded into w/b.
    x = dot(x, w_ohbn[...]) + b_ohbn[...]
    # TODO(synk): dropout(p=0.1) reproduced in inference mode (identity).
    x = lrelu(x)

    # Edge scoring: project node features to per-endpoint scalar scores first,
    # then one fused one-hot gather sums both endpoint contributions per edge.
    s_in = dot(x, w_pin[...])                            # [N, 1]
    s_out = dot(x, w_pout[...])                          # [N, 1]
    s_cat = jnp.concatenate([s_in, s_out], axis=0)       # [2N, 1]
    fc = dot(g2_ref[...], s_cat.astype(bf16)) + b_post[...]   # [E, 1]

    # logistic noise from uniform(1e-10, 1-1e-10), then sigmoid (EUP ops, in-kernel).
    u = noise_ref[...]
    noise = jnp.log(u) - jnp.log(1.0 - u)
    z = jax.nn.sigmoid((fc + noise) / 0.3)               # [E, 1]

    # reshape(-1,48) -> split 24/24 -> average -> duplicate -> reshape(-1,1),
    # done with static sublane slices (offsets are multiples of 8) — no [E,E] matmul.
    for g in range(n_groups):
        base = 48 * g
        lo = z[base:base + 24, :]
        hi = z[base + 24:base + 48, :]
        avg = 0.5 * (lo + hi)
        out_ref[base:base + 24, :] = avg
        out_ref[base + 24:base + 48, :] = avg


# ---------------------------------------------------------------------------
# Wrapper: build (bf16) gather/scatter matrices + call the kernel.
# ---------------------------------------------------------------------------
def sage_edge2_forward(x, edge_index, edge_attr, params, noise_key):
    n = x.shape[0]
    e = edge_index.shape[1]
    assert e % 48 == 0, "final reshape(-1, 48) requires E % 48 == 0"
    n_groups = e // 48

    src = edge_index[0]
    dst = edge_index[1]
    gsrc = jax.nn.one_hot(src, n, dtype=jnp.bfloat16)        # [E, N]
    gdst = jax.nn.one_hot(dst, n, dtype=jnp.bfloat16)        # [E, N]
    g2 = jnp.concatenate([gsrc, gdst], axis=1)               # [E, 2N] scoring gather
    ssum = gdst.T                                            # [N, E] scatter-sum
    deg = jnp.sum(gdst.astype(jnp.float32), axis=0)          # f32 in-degree
    inv_deg = (1.0 / jnp.maximum(deg, 1.0))[:, None]         # [N, 1] f32

    noise = jax.random.uniform(noise_key, (e, 1), jnp.float32,
                               minval=1e-10, maxval=1.0 - 1e-10)

    inputs = [x, gsrc, g2, ssum, inv_deg, edge_attr, noise] + list(params)
    kernel = functools.partial(sage_edge2_kernel, n_groups=n_groups)

    return pl.pallas_call(
        kernel,
        out_shape=jax.ShapeDtypeStruct((e, 1), jnp.float32),
        in_specs=[pl.BlockSpec(memory_space=pltpu.MemorySpace.VMEM)] * len(inputs),
        out_specs=pl.BlockSpec(memory_space=pltpu.MemorySpace.VMEM),
        compiler_params=pltpu.CompilerParams(vmem_limit_bytes=32 << 20),
    )(*inputs)


# ---------------------------------------------------------------------------
# Deterministic parameter init (PyTorch-Linear-style uniform bounds, synthetic).
# Weights stored pre-transposed as [fan_in, fan_out]; biases as [1, fan_out].
# The fusions / foldings requested by the perf review happen here (host side).
# ---------------------------------------------------------------------------
def _linear(key, fan_in, fan_out, bias=True):
    kw, kb = jax.random.split(key)
    bound = 1.0 / (fan_in ** 0.5)
    w = jax.random.uniform(kw, (fan_in, fan_out), jnp.float32, -bound, bound)
    if not bias:
        return (w,)
    b = jax.random.uniform(kb, (1, fan_out), jnp.float32, -bound, bound)
    return (w, b)


def build_params(in_channels, hidden, out_channels):
    key = jax.random.PRNGKey(12345)
    keys = jax.random.split(key, 16)
    p = []

    def conv_params(k, cin, cout):
        k1, k2, k3 = jax.random.split(k, 3)
        we, be = _linear(k1, 1, cin)                     # lin_e: Linear(1, cin) -> [1, cin]
        wl, bl = _linear(k2, cin, cout)                  # lin_l (bias)
        (wr,) = _linear(k3, cin, cout, bias=False)       # lin_r (no bias)
        w_cat = jnp.concatenate([wl, wr], axis=0)        # [2*cin, cout]: rows 0..cin-1 -> aggr
        return [we, be, w_cat, bl]

    p += _linear(keys[0], in_channels, hidden)           # prelin
    p += conv_params(keys[1], hidden, hidden)            # conv1
    p += _linear(keys[2], hidden, hidden)                # lin_hh1
    p += conv_params(keys[3], hidden, hidden)            # conv2
    p += _linear(keys[4], hidden, hidden)                # lin_hh2
    p += conv_params(keys[5], hidden, out_channels)      # conv3
    p += _linear(keys[6], out_channels, out_channels)    # lin_oo

    # lin_oh with BatchNorm1d (eval mode, fresh running stats: mean=0, var=1) folded in.
    w_oh, b_oh = _linear(keys[7], out_channels, hidden)
    gamma = jnp.ones((1, hidden), jnp.float32)
    beta = jnp.zeros((1, hidden), jnp.float32)
    bn_scale = gamma / jnp.sqrt(1.0 + 1e-5)
    p += [w_oh * bn_scale, b_oh * bn_scale + beta]

    # postlin: Linear(2H -> 1), split into per-endpoint [H,1] halves.
    w_post, b_post = _linear(keys[8], 2 * hidden, 1)
    p += [w_post[:hidden, :], w_post[hidden:, :], b_post]
    return p


if __name__ == "__main__":
    # in_channels = 16 mirrors the ResNet fc (64 -> 16) that feeds SAGE_edge2.
    IN_CH, HIDDEN, OUT_CH = 16, 32, 16
    N_NODES, N_EDGES = 16, 48    # E must be a multiple of 48 (final reshape)

    root = jax.random.PRNGKey(0)
    kx, ke, ka, kn = jax.random.split(root, 4)

    x = jax.random.normal(kx, (N_NODES, IN_CH), jnp.float32)
    edge_index = jax.random.randint(ke, (2, N_EDGES), 0, N_NODES, dtype=jnp.int32)
    edge_attr = jax.random.uniform(ka, (N_EDGES, 1), jnp.float32)

    params = build_params(IN_CH, HIDDEN, OUT_CH)

    out = sage_edge2_forward(x, edge_index, edge_attr, params, kn)
    out = jax.block_until_ready(out)

    assert out.shape == (N_EDGES, 1)
    assert bool(jnp.all(jnp.isfinite(out)))
    assert bool(jnp.all((out >= 0.0) & (out <= 1.0)))   # averaged sigmoid outputs
    print("KERNEL_OK")
</pallas_src>

<mosaic_0001>
module attributes {stable_mosaic.version = 11 : i64} {
  func.func @sage_edge2_kernel(%arg0: memref<16x16xf32, #tpu.memory_space<vmem>>, %arg1: memref<48x16xbf16, #tpu.memory_space<vmem>>, %arg2: memref<48x32xbf16, #tpu.memory_space<vmem>>, %arg3: memref<16x48xbf16, #tpu.memory_space<vmem>>, %arg4: memref<16x1xf32, #tpu.memory_space<vmem>>, %arg5: memref<48x1xf32, #tpu.memory_space<vmem>>, %arg6: memref<48x1xf32, #tpu.memory_space<vmem>>, %arg7: memref<16x32xf32, #tpu.memory_space<vmem>>, %arg8: memref<1x32xf32, #tpu.memory_space<vmem>>, %arg9: memref<1x32xf32, #tpu.memory_space<vmem>>, %arg10: memref<1x32xf32, #tpu.memory_space<vmem>>, %arg11: memref<64x32xf32, #tpu.memory_space<vmem>>, %arg12: memref<1x32xf32, #tpu.memory_space<vmem>>, %arg13: memref<32x32xf32, #tpu.memory_space<vmem>>, %arg14: memref<1x32xf32, #tpu.memory_space<vmem>>, %arg15: memref<1x32xf32, #tpu.memory_space<vmem>>, %arg16: memref<1x32xf32, #tpu.memory_space<vmem>>, %arg17: memref<64x32xf32, #tpu.memory_space<vmem>>, %arg18: memref<1x32xf32, #tpu.memory_space<vmem>>, %arg19: memref<32x32xf32, #tpu.memory_space<vmem>>, %arg20: memref<1x32xf32, #tpu.memory_space<vmem>>, %arg21: memref<1x32xf32, #tpu.memory_space<vmem>>, %arg22: memref<1x32xf32, #tpu.memory_space<vmem>>, %arg23: memref<64x16xf32, #tpu.memory_space<vmem>>, %arg24: memref<1x16xf32, #tpu.memory_space<vmem>>, %arg25: memref<16x16xf32, #tpu.memory_space<vmem>>, %arg26: memref<1x16xf32, #tpu.memory_space<vmem>>, %arg27: memref<16x32xf32, #tpu.memory_space<vmem>>, %arg28: memref<1x32xf32, #tpu.memory_space<vmem>>, %arg29: memref<32x1xf32, #tpu.memory_space<vmem>>, %arg30: memref<32x1xf32, #tpu.memory_space<vmem>>, %arg31: memref<1x1xf32, #tpu.memory_space<vmem>>, %arg32: memref<48x1xf32, #tpu.memory_space<vmem>>) attributes {dimension_semantics = [], scalar_prefetch = 0 : i64, scratch_operands = 0 : i64, tpu.core_type = #tpu.core_type<tc>} {
    %c0 = arith.constant 0 : index
    %c0_0 = arith.constant 0 : index
    %0 = vector.load %arg1[%c0, %c0_0] : memref<48x16xbf16, #tpu.memory_space<vmem>>, vector<48x16xbf16>
    %c0_1 = arith.constant 0 : index
    %c0_2 = arith.constant 0 : index
    %1 = vector.load %arg3[%c0_1, %c0_2] : memref<16x48xbf16, #tpu.memory_space<vmem>>, vector<16x48xbf16>
    %c0_3 = arith.constant 0 : index
    %c0_4 = arith.constant 0 : index
    %2 = vector.load %arg4[%c0_3, %c0_4] : memref<16x1xf32, #tpu.memory_space<vmem>>, vector<16x1xf32>
    %c0_5 = arith.constant 0 : index
    %c0_6 = arith.constant 0 : index
    %3 = vector.load %arg5[%c0_5, %c0_6] : memref<48x1xf32, #tpu.memory_space<vmem>>, vector<48x1xf32>
    %c0_7 = arith.constant 0 : index
    %c0_8 = arith.constant 0 : index
    %4 = vector.load %arg0[%c0_7, %c0_8] : memref<16x16xf32, #tpu.memory_space<vmem>>, vector<16x16xf32>
    %c0_9 = arith.constant 0 : index
    %c0_10 = arith.constant 0 : index
    %5 = vector.load %arg7[%c0_9, %c0_10] : memref<16x32xf32, #tpu.memory_space<vmem>>, vector<16x32xf32>
    %cst = arith.constant dense<0.000000e+00> : vector<16x32xf32>
    %6 = tpu.matmul %4, %5, %cst {dimension_numbers = #tpu.dot_dimension_numbers<[1], [0], [0], [1], [0, 0, 1, 1], [], []>} : vector<16x16xf32>, vector<16x32xf32>, vector<16x32xf32> -> vector<16x32xf32>
    %c0_11 = arith.constant 0 : index
    %c0_12 = arith.constant 0 : index
    %7 = vector.load %arg8[%c0_11, %c0_12] : memref<1x32xf32, #tpu.memory_space<vmem>>, vector<1x32xf32>
    %8 = vector.broadcast %7 : vector<1x32xf32> to vector<16x32xf32>
    %9 = arith.addf %6, %8 : vector<16x32xf32>
    %cst_13 = arith.constant 0.000000e+00 : f32
    %10 = vector.broadcast %cst_13 : f32 to vector<16x32xf32>
    %11 = arith.maximumf %9, %10 : vector<16x32xf32>
    %12 = arith.truncf %11 : vector<16x32xf32> to vector<16x32xbf16>
    %cst_14 = arith.constant dense<0.000000e+00> : vector<48x32xf32>
    %13 = tpu.matmul %0, %12, %cst_14 {dimension_numbers = #tpu.dot_dimension_numbers<[1], [0], [0], [1], [0, 0, 1, 1], [], []>} : vector<48x16xbf16>, vector<16x32xbf16>, vector<48x32xf32> -> vector<48x32xf32>
    %c0_15 = arith.constant 0 : index
    %c0_16 = arith.constant 0 : index
    %14 = vector.load %arg9[%c0_15, %c0_16] : memref<1x32xf32, #tpu.memory_space<vmem>>, vector<1x32xf32>
    %15 = vector.broadcast %3 : vector<48x1xf32> to vector<48x32xf32>
    %16 = vector.broadcast %14 : vector<1x32xf32> to vector<48x32xf32>
    %17 = arith.mulf %15, %16 : vector<48x32xf32>
    %c0_17 = arith.constant 0 : index
    %c0_18 = arith.constant 0 : index
    %18 = vector.load %arg10[%c0_17, %c0_18] : memref<1x32xf32, #tpu.memory_space<vmem>>, vector<1x32xf32>
    %19 = vector.broadcast %18 : vector<1x32xf32> to vector<48x32xf32>
    %20 = arith.addf %17, %19 : vector<48x32xf32>
    %21 = arith.addf %13, %20 : vector<48x32xf32>
    %cst_19 = arith.constant 0.000000e+00 : f32
    %22 = vector.broadcast %cst_19 : f32 to vector<48x32xf32>
    %23 = arith.maximumf %21, %22 : vector<48x32xf32>
    %24 = arith.truncf %23 : vector<48x32xf32> to vector<48x32xbf16>
    %cst_20 = arith.constant dense<0.000000e+00> : vector<16x32xf32>
    %25 = tpu.matmul %1, %24, %cst_20 {dimension_numbers = #tpu.dot_dimension_numbers<[1], [0], [0], [1], [0, 0, 1, 1], [], []>} : vector<16x48xbf16>, vector<48x32xbf16>, vector<16x32xf32> -> vector<16x32xf32>
    %26 = vector.broadcast %2 : vector<16x1xf32> to vector<16x32xf32>
    %27 = arith.mulf %25, %26 : vector<16x32xf32>
    %28 = tpu.concatenate %27, %11 in 1 : vector<16x32xf32>, vector<16x32xf32> -> vector<16x64xf32>
    %c0_21 = arith.constant 0 : index
    %c0_22 = arith.constant 0 : index
    %29 = vector.load %arg11[%c0_21, %c0_22] : memref<64x32xf32, #tpu.memory_space<vmem>>, vector<64x32xf32>
    %cst_23 = arith.constant dense<0.000000e+00> : vector<16x32xf32>
    %30 = tpu.matmul %28, %29, %cst_23 {dimension_numbers = #tpu.dot_dimension_numbers<[1], [0], [0], [1], [0, 0, 1, 1], [], []>} : vector<16x64xf32>, vector<64x32xf32>, vector<16x32xf32> -> vector<16x32xf32>
    %c0_24 = arith.constant 0 : index
    %c0_25 = arith.constant 0 : index
    %31 = vector.load %arg12[%c0_24, %c0_25] : memref<1x32xf32, #tpu.memory_space<vmem>>, vector<1x32xf32>
    %32 = vector.broadcast %31 : vector<1x32xf32> to vector<16x32xf32>
    %33 = arith.addf %30, %32 : vector<16x32xf32>
    %cst_26 = arith.constant 0.000000e+00 : f32
    %34 = vector.broadcast %cst_26 : f32 to vector<16x32xf32>
    %35 = arith.maximumf %33, %34 : vector<16x32xf32>
    %c0_27 = arith.constant 0 : index
    %c0_28 = arith.constant 0 : index
    %36 = vector.load %arg13[%c0_27, %c0_28] : memref<32x32xf32, #tpu.memory_space<vmem>>, vector<32x32xf32>
    %cst_29 = arith.constant dense<0.000000e+00> : vector<16x32xf32>
    %37 = tpu.matmul %35, %36, %cst_29 {dimension_numbers = #tpu.dot_dimension_numbers<[1], [0], [0], [1], [0, 0, 1, 1], [], []>} : vector<16x32xf32>, vector<32x32xf32>, vector<16x32xf32> -> vector<16x32xf32>
    %c0_30 = arith.constant 0 : index
    %c0_31 = arith.constant 0 : index
    %38 = vector.load %arg14[%c0_30, %c0_31] : memref<1x32xf32, #tpu.memory_space<vmem>>, vector<1x32xf32>
    %39 = vector.broadcast %38 : vector<1x32xf32> to vector<16x32xf32>
    %40 = arith.addf %37, %39 : vector<16x32xf32>
    %cst_32 = arith.constant 0.000000e+00 : f32
    %41 = vector.broadcast %cst_32 : f32 to vector<16x32xf32>
    %42 = arith.cmpf oge, %40, %41 : vector<16x32xf32>
    %cst_33 = arith.constant 0.00999999977 : f32
    %43 = vector.broadcast %cst_33 : f32 to vector<16x32xf32>
    %44 = arith.mulf %43, %40 : vector<16x32xf32>
    %45 = arith.select %42, %40, %44 : vector<16x32xi1>, vector<16x32xf32>
    %46 = arith.truncf %45 : vector<16x32xf32> to vector<16x32xbf16>
    %cst_34 = arith.constant dense<0.000000e+00> : vector<48x32xf32>
    %47 = tpu.matmul %0, %46, %cst_34 {dimension_numbers = #tpu.dot_dimension_numbers<[1], [0], [0], [1], [0, 0, 1, 1], [], []>} : vector<48x16xbf16>, vector<16x32xbf16>, vector<48x32xf32> -> vector<48x32xf32>
    %c0_35 = arith.constant 0 : index
    %c0_36 = arith.constant 0 : index
    %48 = vector.load %arg15[%c0_35, %c0_36] : memref<1x32xf32, #tpu.memory_space<vmem>>, vector<1x32xf32>
    %49 = vector.broadcast %3 : vector<48x1xf32> to vector<48x32xf32>
    %50 = vector.broadcast %48 : vector<1x32xf32> to vector<48x32xf32>
    %51 = arith.mulf %49, %50 : vector<48x32xf32>
    %c0_37 = arith.constant 0 : index
    %c0_38 = arith.constant 0 : index
    %52 = vector.load %arg16[%c0_37, %c0_38] : memref<1x32xf32, #tpu.memory_space<vmem>>, vector<1x32xf32>
    %53 = vector.broadcast %52 : vector<1x32xf32> to vector<48x32xf32>
    %54 = arith.addf %51, %53 : vector<48x32xf32>
    %55 = arith.addf %47, %54 : vector<48x32xf32>
    %cst_39 = arith.constant 0.000000e+00 : f32
    %56 = vector.broadcast %cst_39 : f32 to vector<48x32xf32>
    %57 = arith.maximumf %55, %56 : vector<48x32xf32>
    %58 = arith.truncf %57 : vector<48x32xf32> to vector<48x32xbf16>
    %cst_40 = arith.constant dense<0.000000e+00> : vector<16x32xf32>
    %59 = tpu.matmul %1, %58, %cst_40 {dimension_numbers = #tpu.dot_dimension_numbers<[1], [0], [0], [1], [0, 0, 1, 1], [], []>} : vector<16x48xbf16>, vector<48x32xbf16>, vector<16x32xf32> -> vector<16x32xf32>
    %60 = vector.broadcast %2 : vector<16x1xf32> to vector<16x32xf32>
    %61 = arith.mulf %59, %60 : vector<16x32xf32>
    %62 = tpu.concatenate %61, %45 in 1 : vector<16x32xf32>, vector<16x32xf32> -> vector<16x64xf32>
    %c0_41 = arith.constant 0 : index
    %c0_42 = arith.constant 0 : index
    %63 = vector.load %arg17[%c0_41, %c0_42] : memref<64x32xf32, #tpu.memory_space<vmem>>, vector<64x32xf32>
    %cst_43 = arith.constant dense<0.000000e+00> : vector<16x32xf32>
    %64 = tpu.matmul %62, %63, %cst_43 {dimension_numbers = #tpu.dot_dimension_numbers<[1], [0], [0], [1], [0, 0, 1, 1], [], []>} : vector<16x64xf32>, vector<64x32xf32>, vector<16x32xf32> -> vector<16x32xf32>
    %c0_44 = arith.constant 0 : index
    %c0_45 = arith.constant 0 : index
    %65 = vector.load %arg18[%c0_44, %c0_45] : memref<1x32xf32, #tpu.memory_space<vmem>>, vector<1x32xf32>
    %66 = vector.broadcast %65 : vector<1x32xf32> to vector<16x32xf32>
    %67 = arith.addf %64, %66 : vector<16x32xf32>
    %cst_46 = arith.constant 0.000000e+00 : f32
    %68 = vector.broadcast %cst_46 : f32 to vector<16x32xf32>
    %69 = arith.maximumf %67, %68 : vector<16x32xf32>
    %c0_47 = arith.constant 0 : index
    %c0_48 = arith.constant 0 : index
    %70 = vector.load %arg19[%c0_47, %c0_48] : memref<32x32xf32, #tpu.memory_space<vmem>>, vector<32x32xf32>
    %cst_49 = arith.constant dense<0.000000e+00> : vector<16x32xf32>
    %71 = tpu.matmul %69, %70, %cst_49 {dimension_numbers = #tpu.dot_dimension_numbers<[1], [0], [0], [1], [0, 0, 1, 1], [], []>} : vector<16x32xf32>, vector<32x32xf32>, vector<16x32xf32> -> vector<16x32xf32>
    %c0_50 = arith.constant 0 : index
    %c0_51 = arith.constant 0 : index
    %72 = vector.load %arg20[%c0_50, %c0_51] : memref<1x32xf32, #tpu.memory_space<vmem>>, vector<1x32xf32>
    %73 = vector.broadcast %72 : vector<1x32xf32> to vector<16x32xf32>
    %74 = arith.addf %71, %73 : vector<16x32xf32>
    %cst_52 = arith.constant 0.000000e+00 : f32
    %75 = vector.broadcast %cst_52 : f32 to vector<16x32xf32>
    %76 = arith.cmpf oge, %74, %75 : vector<16x32xf32>
    %cst_53 = arith.constant 0.00999999977 : f32
    %77 = vector.broadcast %cst_53 : f32 to vector<16x32xf32>
    %78 = arith.mulf %77, %74 : vector<16x32xf32>
    %79 = arith.select %76, %74, %78 : vector<16x32xi1>, vector<16x32xf32>
    %80 = arith.truncf %79 : vector<16x32xf32> to vector<16x32xbf16>
    %cst_54 = arith.constant dense<0.000000e+00> : vector<48x32xf32>
    %81 = tpu.matmul %0, %80, %cst_54 {dimension_numbers = #tpu.dot_dimension_numbers<[1], [0], [0], [1], [0, 0, 1, 1], [], []>} : vector<48x16xbf16>, vector<16x32xbf16>, vector<48x32xf32> -> vector<48x32xf32>
    %c0_55 = arith.constant 0 : index
    %c0_56 = arith.constant 0 : index
    %82 = vector.load %arg21[%c0_55, %c0_56] : memref<1x32xf32, #tpu.memory_space<vmem>>, vector<1x32xf32>
    %83 = vector.broadcast %3 : vector<48x1xf32> to vector<48x32xf32>
    %84 = vector.broadcast %82 : vector<1x32xf32> to vector<48x32xf32>
    %85 = arith.mulf %83, %84 : vector<48x32xf32>
    %c0_57 = arith.constant 0 : index
    %c0_58 = arith.constant 0 : index
    %86 = vector.load %arg22[%c0_57, %c0_58] : memref<1x32xf32, #tpu.memory_space<vmem>>, vector<1x32xf32>
    %87 = vector.broadcast %86 : vector<1x32xf32> to vector<48x32xf32>
    %88 = arith.addf %85, %87 : vector<48x32xf32>
    %89 = arith.addf %81, %88 : vector<48x32xf32>
    %cst_59 = arith.constant 0.000000e+00 : f32
    %90 = vector.broadcast %cst_59 : f32 to vector<48x32xf32>
    %91 = arith.maximumf %89, %90 : vector<48x32xf32>
    %92 = arith.truncf %91 : vector<48x32xf32> to vector<48x32xbf16>
    %cst_60 = arith.constant dense<0.000000e+00> : vector<16x32xf32>
    %93 = tpu.matmul %1, %92, %cst_60 {dimension_numbers = #tpu.dot_dimension_numbers<[1], [0], [0], [1], [0, 0, 1, 1], [], []>} : vector<16x48xbf16>, vector<48x32xbf16>, vector<16x32xf32> -> vector<16x32xf32>
    %94 = vector.broadcast %2 : vector<16x1xf32> to vector<16x32xf32>
    %95 = arith.mulf %93, %94 : vector<16x32xf32>
    %96 = tpu.concatenate %95, %79 in 1 : vector<16x32xf32>, vector<16x32xf32> -> vector<16x64xf32>
    %c0_61 = arith.constant 0 : index
    %c0_62 = arith.constant 0 : index
    %97 = vector.load %arg23[%c0_61, %c0_62] : memref<64x16xf32, #tpu.memory_space<vmem>>, vector<64x16xf32>
    %cst_63 = arith.constant dense<0.000000e+00> : vector<16x16xf32>
    %98 = tpu.matmul %96, %97, %cst_63 {dimension_numbers = #tpu.dot_dimension_numbers<[1], [0], [0], [1], [0, 0, 1, 1], [], []>} : vector<16x64xf32>, vector<64x16xf32>, vector<16x16xf32> -> vector<16x16xf32>
    %c0_64 = arith.constant 0 : index
    %c0_65 = arith.constant 0 : index
    %99 = vector.load %arg24[%c0_64, %c0_65] : memref<1x16xf32, #tpu.memory_space<vmem>>, vector<1x16xf32>
    %100 = vector.broadcast %99 : vector<1x16xf32> to vector<16x16xf32>
    %101 = arith.addf %98, %100 : vector<16x16xf32>
    %cst_66 = arith.constant 0.000000e+00 : f32
    %102 = vector.broadcast %cst_66 : f32 to vector<16x16xf32>
    %103 = arith.maximumf %101, %102 : vector<16x16xf32>
    %c0_67 = arith.constant 0 : index
    %c0_68 = arith.constant 0 : index
    %104 = vector.load %arg25[%c0_67, %c0_68] : memref<16x16xf32, #tpu.memory_space<vmem>>, vector<16x16xf32>
    %cst_69 = arith.constant dense<0.000000e+00> : vector<16x16xf32>
    %105 = tpu.matmul %103, %104, %cst_69 {dimension_numbers = #tpu.dot_dimension_numbers<[1], [0], [0], [1], [0, 0, 1, 1], [], []>} : vector<16x16xf32>, vector<16x16xf32>, vector<16x16xf32> -> vector<16x16xf32>
    %c0_70 = arith.constant 0 : index
    %c0_71 = arith.constant 0 : index
    %106 = vector.load %arg26[%c0_70, %c0_71] : memref<1x16xf32, #tpu.memory_space<vmem>>, vector<1x16xf32>
    %107 = vector.broadcast %106 : vector<1x16xf32> to vector<16x16xf32>
    %108 = arith.addf %105, %107 : vector<16x16xf32>
    %cst_72 = arith.constant 0.000000e+00 : f32
    %109 = vector.broadcast %cst_72 : f32 to vector<16x16xf32>
    %110 = arith.cmpf oge, %108, %109 : vector<16x16xf32>
    %cst_73 = arith.constant 0.00999999977 : f32
    %111 = vector.broadcast %cst_73 : f32 to vector<16x16xf32>
    %112 = arith.mulf %111, %108 : vector<16x16xf32>
    %113 = arith.select %110, %108, %112 : vector<16x16xi1>, vector<16x16xf32>
    %c0_74 = arith.constant 0 : index
    %c0_75 = arith.constant 0 : index
    %114 = vector.load %arg27[%c0_74, %c0_75] : memref<16x32xf32, #tpu.memory_space<vmem>>, vector<16x32xf32>
    %cst_76 = arith.constant dense<0.000000e+00> : vector<16x32xf32>
    %115 = tpu.matmul %113, %114, %cst_76 {dimension_numbers = #tpu.dot_dimension_numbers<[1], [0], [0], [1], [0, 0, 1, 1], [], []>} : vector<16x16xf32>, vector<16x32xf32>, vector<16x32xf32> -> vector<16x32xf32>
    %c0_77 = arith.constant 0 : index
    %c0_78 = arith.constant 0 : index
    %116 = vector.load %arg28[%c0_77, %c0_78] : memref<1x32xf32, #tpu.memory_space<vmem>>, vector<1x32xf32>
    %117 = vector.broadcast %116 : vector<1x32xf32> to vector<16x32xf32>
    %118 = arith.addf %115, %117 : vector<16x32xf32>
    %cst_79 = arith.constant 0.000000e+00 : f32
    %119 = vector.broadcast %cst_79 : f32 to vector<16x32xf32>
    %120 = arith.cmpf oge, %118, %119 : vector<16x32xf32>
    %cst_80 = arith.constant 0.00999999977 : f32
    %121 = vector.broadcast %cst_80 : f32 to vector<16x32xf32>
    %122 = arith.mulf %121, %118 : vector<16x32xf32>
    %123 = arith.select %120, %118, %122 : vector<16x32xi1>, vector<16x32xf32>
    %c0_81 = arith.constant 0 : index
    %c0_82 = arith.constant 0 : index
    %124 = vector.load %arg29[%c0_81, %c0_82] : memref<32x1xf32, #tpu.memory_space<vmem>>, vector<32x1xf32>
    %cst_83 = arith.constant dense<0.000000e+00> : vector<16x1xf32>
    %125 = tpu.matmul %123, %124, %cst_83 {dimension_numbers = #tpu.dot_dimension_numbers<[1], [0], [0], [1], [0, 0, 1, 1], [], []>} : vector<16x32xf32>, vector<32x1xf32>, vector<16x1xf32> -> vector<16x1xf32>
    %c0_84 = arith.constant 0 : index
    %c0_85 = arith.constant 0 : index
    %126 = vector.load %arg30[%c0_84, %c0_85] : memref<32x1xf32, #tpu.memory_space<vmem>>, vector<32x1xf32>
    %cst_86 = arith.constant dense<0.000000e+00> : vector<16x1xf32>
    %127 = tpu.matmul %123, %126, %cst_86 {dimension_numbers = #tpu.dot_dimension_numbers<[1], [0], [0], [1], [0, 0, 1, 1], [], []>} : vector<16x32xf32>, vector<32x1xf32>, vector<16x1xf32> -> vector<16x1xf32>
    %128 = tpu.concatenate %125, %127 in 0 : vector<16x1xf32>, vector<16x1xf32> -> vector<32x1xf32>
    %c0_87 = arith.constant 0 : index
    %c0_88 = arith.constant 0 : index
    %129 = vector.load %arg2[%c0_87, %c0_88] : memref<48x32xbf16, #tpu.memory_space<vmem>>, vector<48x32xbf16>
    %130 = arith.truncf %128 : vector<32x1xf32> to vector<32x1xbf16>
    %cst_89 = arith.constant dense<0.000000e+00> : vector<48x1xf32>
    %131 = tpu.matmul %129, %130, %cst_89 {dimension_numbers = #tpu.dot_dimension_numbers<[1], [0], [0], [1], [0, 0, 1, 1], [], []>} : vector<48x32xbf16>, vector<32x1xbf16>, vector<48x1xf32> -> vector<48x1xf32>
    %c0_90 = arith.constant 0 : index
    %c0_91 = arith.constant 0 : index
    %132 = vector.load %arg31[%c0_90, %c0_91] : memref<1x1xf32, #tpu.memory_space<vmem>>, vector<1x1xf32>
    %133 = vector.broadcast %132 : vector<1x1xf32> to vector<48x1xf32>
    %134 = arith.addf %131, %133 : vector<48x1xf32>
    %c0_92 = arith.constant 0 : index
    %c0_93 = arith.constant 0 : index
    %135 = vector.load %arg6[%c0_92, %c0_93] : memref<48x1xf32, #tpu.memory_space<vmem>>, vector<48x1xf32>
    %136 = math.log %135 : vector<48x1xf32>
    %cst_94 = arith.constant 1.000000e+00 : f32
    %137 = vector.broadcast %cst_94 : f32 to vector<48x1xf32>
    %138 = arith.subf %137, %135 : vector<48x1xf32>
    %139 = math.log %138 : vector<48x1xf32>
    %140 = arith.subf %136, %139 : vector<48x1xf32>
    %141 = arith.addf %134, %140 : vector<48x1xf32>
    %cst_95 = arith.constant 3.000000e-01 : f32
    %142 = vector.broadcast %cst_95 : f32 to vector<48x1xf32>
    %143 = arith.divf %141, %142 : vector<48x1xf32>
    %144 = arith.negf %143 : vector<48x1xf32>
    %145 = math.exp %144 : vector<48x1xf32>
    %cst_96 = arith.constant 1.000000e+00 : f32
    %146 = vector.broadcast %cst_96 : f32 to vector<48x1xf32>
    %147 = arith.addf %146, %145 : vector<48x1xf32>
    %148 = arith.divf %146, %147 : vector<48x1xf32>
    %149 = vector.extract_strided_slice %148 {offsets = [0, 0], sizes = [24, 1], strides = [1, 1]} : vector<48x1xf32> to vector<24x1xf32>
    %150 = vector.extract_strided_slice %148 {offsets = [24, 0], sizes = [24, 1], strides = [1, 1]} : vector<48x1xf32> to vector<24x1xf32>
    %151 = arith.addf %149, %150 : vector<24x1xf32>
    %cst_97 = arith.constant 5.000000e-01 : f32
    %152 = vector.broadcast %cst_97 : f32 to vector<24x1xf32>
    %153 = arith.mulf %152, %151 : vector<24x1xf32>
    %c0_98 = arith.constant 0 : index
    %c0_99 = arith.constant 0 : index
    %154 = vector.load %arg32[%c0_98, %c0_99] : memref<48x1xf32, #tpu.memory_space<vmem>>, vector<24x1xf32>
    tpu.vector_store %arg32[%c0_98, %c0_99], %153 {strides = array<i32>} : memref<48x1xf32, #tpu.memory_space<vmem>>, vector<24x1xf32>,
    %c24 = arith.constant 24 : index
    %c0_100 = arith.constant 0 : index
    %155 = vector.load %arg32[%c24, %c0_100] : memref<48x1xf32, #tpu.memory_space<vmem>>, vector<24x1xf32>
    tpu.vector_store %arg32[%c24, %c0_100], %153 {strides = array<i32>} : memref<48x1xf32, #tpu.memory_space<vmem>>, vector<24x1xf32>,
    return
  }
}

</mosaic_0001>

<bundles_post_ra>
// kernel: tpu_custom_call.1
= control target key start
LH: loop header
LB: loop body
LE: loop exit
PB: predicated region body
PF: predicated region fallthrough
CT: control target
= control target key end

     0   :  { %s2395_s3 = smov 7   ;;  %v2396_v0 = vmov 0   ;;  %s2397_s10 = smov 5   ;;  %vm164_vm0 = vcmask 130048   ;;  %v2400_v14 = vmov 0.0   ;;  %vm2401_vm1 = vmmov 0   ;;  %s2719_s0 = inlined_call_operand.smem [shape: u32[33], index: -1, kind: input, shape index: {}] }
   0x1   :  { %s1817_s6 = sld [smem:[%s2719_s0 + %s2395_s3]]   ;;  %2339 = vset.pattern.permute.xlu1 %v2396_v0  ;;  %2338 = vset.pattern.permute.xlu0 %v2396_v0  ;;  %s2398_s14 = smov 4   ;;  %vm400_vm2 = vcmask 392192   ;;  %vm465_vm3 = vcmask 261120   ;;  %vm483_vm4 = vcmask 523264   ;;  %vm1800_vm13 = vcmask 7168  }
   0x2   :  { %s1_s9 = sld [smem:[%s2719_s0]]   ;;  %s2399_s18 = smov 1   ;;  %2008 = vmatprep.subr.bf16.mxu1 %v2400_v14  ;;  %2010 = vmatprep.mubr.msk.bf16.mxu1 %vm2401_vm1, %v2400_v14 }
   0x3   :  { %s1815_s13 = sld [smem:[%s2719_s0 + %s2397_s10]]   ;;  %s2402_s22 = smov 8  }
   0x4   :  { %s1814_s17 = sld [smem:[%s2719_s0 + %s2398_s14]]   ;;  %s2403_s26 = smov 32  }
   0x5   :  { %s1811_s21 = sld [smem:[%s2719_s0 + %s2399_s18]]   ;;  %s2404_s27 = smov 3  }
   0x6   :  { %s1818_s25 = sld [smem:[%s2719_s0 + %s2402_s22]]   ;;  %s2405_s1 = smov 9  }
   0x7   :  { %v155_v1 = vld [vmem:[%s1817_s6] sm:$0xff]  ;;  %v156_v2 = vld [vmem:[%s1817_s6 + $0x8] sm:$0xff]  ;;  %s2482_s30 = sld [smem:[%s2719_s0 + %s2404_s27]]   ;;  %s2406_s5 = smov 10  }
   0x8   :  { %v153_v3 = vld [vmem:[%s1_s9] sm:$0xff]  ;;  %v2211_v4 = vpack.c.bf16 %v156_v2, %v155_v1  ;;  %v154_v9 = vld [vmem:[%s1_s9 + $0x8] sm:$0xff]  ;;  %s1819_s4 = sld [smem:[%s2719_s0 + %s2405_s1]]   ;;  %s2407_s9 = smov 11  }
   0x9   :  { %2005 = vmatprep.mubr.msk.f32.mxu0 %vm164_vm0, %v153_v3  ;;  %v149_v5 = vld [vmem:[%s1815_s13 + $0x10] sm:$0xff]  ;;  %v147_v6 = vld [vmem:[%s1815_s13] sm:$0xff]  ;;  %v150_v7 = vld [vmem:[%s1815_s13 + $0x18] sm:$0xff]  ;;  %s1820_s8 = sld [smem:[%s2719_s0 + %s2406_s5]]  }
   0xa   :  { %262 = vperm.xlu1 %2339, %v149_v5   ;;  %252 = vperm.xlu0 %2338, %v147_v6   ;;  %v148_v8 = vld [vmem:[%s1815_s13 + $0x8] sm:$0xff]  ;;  %v151_v11 = vld [vmem:[%s1815_s13 + $0x20] sm:$0xff]  ;;  %s2509_s12 = sld [smem:[%s2719_s0 + %s2407_s9]]  }
   0xb   :  { %2212 = vmatprep.subr.bf16.mxu0 %v2211_v4  ;;  %v152_v10 = vld [vmem:[%s1815_s13 + $0x28] sm:$0xff]  ;;  %v145_v13 = vld [vmem:[%s1814_s17] sm:$0xff]  ;;  %v2473_v25 = vld [vmem:[%s1811_s21 + $0x10] sm:$0xff]   ;;  %s2408_s13 = smov 13  }
   0xc   :  { %2214 = vmatpush3.bf16.msra.mxu0 %v2211_v4  ;;  %v146_v12 = vld [vmem:[%s1814_s17 + $0x8] sm:$0xff]  ;;  %v1843_v15 = vld [vmem:[%s1818_s25] ss:$0 sm:$0xff]  ;;  %s1823_s16 = sld [smem:[%s2719_s0 + %s2408_s13]]   ;;  %s2409_s17 = smov 12  }
   0xd   :  { %v2460_v23 = vld [vmem:[%s1811_s21] sm:$0xff]   ;;  %v2467_v24 = vld [vmem:[%s1811_s21 + $0x8] sm:$0xff]   ;;  %s1822_s20 = sld [smem:[%s2719_s0 + %s2409_s17]]   ;;  %s2410_s21 = smov 14  }
   0xe   :  { %267 = vperm.xlu1 %2339, %v150_v7   ;;  %257 = vperm.xlu0 %2338, %v148_v8   ;;  %v1846_v27 = vld [vmem:[%s1819_s4] ss:$0 sm:$0xff]  ;;  %s1824_s24 = sld [smem:[%s2719_s0 + %s2410_s21]]   ;;  %s2411_s25 = smov 17  }
   0xf   :  { %2006 = vmatmul.mubr.msk.f32.vlgmr.msra.gmra.mrb[0].mxu0 %vm164_vm0, %v154_v9  ;;  %v1847_v30 = vld [vmem:[%s1820_s8] ss:$0 sm:$0xff]  ;;  %s2570_s29 = sld [smem:[%s2719_s0 + %s2411_s25]]   ;;  %s2413_s4 = smov 16  }
  0x10   :  { %v468_v6 = vld [vmem:[%s2509_s12] sm:$0xff]  ;;  %v469_v7 = vld [vmem:[%s2509_s12 + $0x8] sm:$0xff]  ;;  %s1826_s7 = sld [smem:[%s2719_s0 + %s2413_s4]]   ;;  %s2414_s8 = smov 19  }
  0x11   :  { %s1829_s11 = sld [smem:[%s2719_s0 + %s2414_s8]]  }
  0x12   :  { %277 = vperm.xlu1 %2339, %v152_v10   ;;  %272 = vperm.xlu0 %2338, %v151_v11   ;;  %v2215_v10 = vpack.c.bf16 %v469_v7, %v468_v6 }
  0x15   :  { %v814_v7 = vld [vmem:[%s2570_s29 + $0x18] sm:$0xff] }
  0x16   :  { %452 = vperm.xlu1 %2339, %v146_v12   ;;  %447 = vperm.xlu0 %2338, %v145_v13   ;;  %v470_v12 = vld [vmem:[%s2509_s12 + $0x10] sm:$0xff]  ;;  %v471_v13 = vld [vmem:[%s2509_s12 + $0x18] sm:$0xff] }
  0x89   :  { %v2490_v26 = vpop.permute.xlu0 %252  ;;  %v2496_v32 = vpop.permute.xlu1 %262 }
  0x8a   :  { %v286_v28 = vmul.f32 %v1846_v27, %v2490_v26  ;;  %v288_v36 = vmul.f32 %v1846_v27, %v2496_v32 }
  0x8c   :  { %v299_v33 = vadd.f32 %v1847_v30, %v286_v28  ;;  %v301_v46 = vadd.f32 %v1847_v30, %v288_v36  ;;  %v568_v28 = vld [vmem:[%s1823_s16 + $0x8] sm:$0xff] }
  0x8d   :  { %v2493_v29 = vpop.permute.xlu0 %257  ;;  %v2499_v39 = vpop.permute.xlu1 %267 }
  0x8e   :  { %v287_v31 = vmul.f32 %v1846_v27, %v2493_v29  ;;  %v289_v41 = vmul.f32 %v1846_v27, %v2499_v39 }
  0x90   :  { %v300_v34 = vadd.f32 %v1847_v30, %v287_v31  ;;  %v302_v48 = vadd.f32 %v1847_v30, %v289_v41 }
  0x91   :  { %v2502_v52 = vpop.permute.xlu0 %272  ;;  %v2511_v57 = vpop.permute.xlu1 %277 }
  0x92   :  { %v290_v54 = vmul.f32 %v1846_v27, %v2502_v52  ;;  %v291_v58 = vmul.f32 %v1846_v27, %v2511_v57  ;;  %v567_v27 = vld [vmem:[%s1823_s16] sm:$0xff] }
  0x94   :  { %v303_v62 = vadd.f32 %v1847_v30, %v290_v54  ;;  %v304_v2 = vadd.f32 %v1847_v30, %v291_v58  ;;  %v2231_v30 = vpack.c.bf16 %v568_v28, %v567_v27 }
  0x95   :  { %v2532_v31 = vpop.permute.xlu0 %447 }
  0x96   :  { %2232 = vmatprep.subr.bf16.mxu0 %v2231_v30 }
  0x97   :  { %2234 = vmatpush3.bf16.msra.mxu0 %v2231_v30 }
  0xe2   :  { %v2007_v16 = vpop.f32.mrb[0].mxu0 }
  0xe3   :  { %v243_v17 = vadd.f32 %v2007_v16, %v1843_v15  ;;  %v237_v18 = vpop.f32.mrb[1].mxu0  ;;  %v2219_v16 = vpack.c.bf16 %v471_v13, %v470_v12 }
  0xe4   :  { %v238_v19 = vadd.f32 %v1843_v15, %v237_v18  ;;  %v2520_v15 = vld [vmem:[%s2482_s30] sm:$0xff]   ;;  %v473_v18 = vld [vmem:[%s2509_s12 + $0x28] sm:$0xff]  ;;  %s2412_s30 = smov 15  }
  0xe5   :  { %v247_v20 = vmax.f32 %v243_v17, 0.0  ;;  %v472_v17 = vld [vmem:[%s2509_s12 + $0x20] sm:$0xff]  ;;  %s1825_s3 = sld [smem:[%s2719_s0 + %s2412_s30]]  }
  0xe6   :  { %v246_v21 = vmax.f32 %v238_v19, 0.0  ;;  %v2223_v19 = vpack.c.bf16 %v473_v18, %v472_v17 }
  0xe7   :  { %461 = vrot.lane.b32.xlu1 %v247_v20, %s2403_s26 }
  0xe8   :  { %459 = vrot.lane.b32.xlu0 %v246_v21, %s2403_s26  ;;  %v248_v22 = vpack.c.bf16 %v247_v20, %v246_v21  ;;  %v474_v20 = vld [vmem:[%s2509_s12 + $0x30] sm:$0xff]  ;;  %v475_v21 = vld [vmem:[%s2509_s12 + $0x38] sm:$0xff]  ;;  %s2415_s12 = smov 18  }
  0xe9   :  { %s1828_s15 = sld [smem:[%s2719_s0 + %s2415_s12]]  }
  0xea   :  { %2009 = vmatpush3.bf16.msra.mxu1 %v248_v22  ;;  %v2227_v22 = vpack.c.bf16 %v475_v21, %v474_v20 }
  0xeb   :  { %2022 = vmatprep.subr.bf16.mxu1 %v2400_v14  ;;  %v1862_v12 = vld [vmem:[%s1825_s3] ss:$0 sm:$0xff]  ;;  %s2420_s3 = smov 25  }
  0xec   :  { %v673_v13 = vmul.f32 %v1862_v12, %v2490_v26  ;;  %v674_v17 = vmul.f32 %v1862_v12, %v2493_v29  ;;  %v675_v28 = vmul.f32 %v1862_v12, %v2496_v32  ;;  %s1835_s6 = sld [smem:[%s2719_s0 + %s2420_s3]]  }
  0xed   :  { %2011 = vmatmul.mubr.msk.bf16.vlgmr.msra.gmra.mrb[0].mxu1 %vm164_vm0, %v2460_v23 }
  0xee   :  { %2014 = vmatprep.mubr.msk.bf16.mxu1 %vm2401_vm1, %v2400_v14 }
  0xf5   :  { %2015 = vmatmul.mubr.msk.bf16.gmra.mrb[4].mxu1 %vm164_vm0, %v2467_v24 }
  0xf6   :  { %2018 = vmatprep.mubr.msk.bf16.mxu1 %vm2401_vm1, %v2400_v14 }
  0xfd   :  { %2019 = vmatmul.mubr.msk.bf16.gmra.mrb[8].mxu1 %vm164_vm0, %v2473_v25 }
  0xfe   :  { %2028 = vmatprep.mubr.msk.bf16.mxu1 %vm2401_vm1, %v2400_v14 }
 0x1c0   :  { %v363_v35 = vpop.f32.mrb[0].mxu1 }
 0x1c1   :  { %v364_v37 = vadd.f32 %v363_v35, %v299_v33  ;;  %v2012_v38 = vpop.f32.mrb[1].mxu1  ;;  %v2534_v33 = vpop.permute.xlu1 %452 }
 0x1c2   :  { %v366_v40 = vpop.f32.mrb[2].mxu1 }
 0x1c3   :  { %v367_v42 = vadd.f32 %v366_v40, %v300_v34  ;;  %v2013_v43 = vpop.f32.mrb[3].mxu1  ;;  %v386_v44 = vmax.f32 %v364_v37, 0.0  ;;  %v460_v37 = vpop.permute.xlu0 %459 }
 0x1c5   :  { %v387_v45 = vmax.f32 %v367_v42, 0.0  ;;  %v462_v43 = vpop.permute.xlu1 %461 }
 0x1c7   :  { %v392_v47 = vpack.c.bf16 %v387_v45, %v386_v44  ;;  %v569_v45 = vld [vmem:[%s1823_s16 + $0x10] sm:$0xff] }
 0x1c8   :  { %v371_v49 = vpop.f32.mrb[4].mxu1 }
 0x1c9   :  { %v372_v50 = vadd.f32 %v371_v49, %v301_v46  ;;  %v2016_v51 = vpop.f32.mrb[5].mxu1  ;;  %2023 = vmatpush3.bf16.msra.mxu1 %v392_v47  ;;  %v570_v46 = vld [vmem:[%s1823_s16 + $0x18] sm:$0xff]  ;;  %s2416_s16 = smov 20  }
 0x1ca   :  { %v374_v53 = vpop.f32.mrb[6].mxu1  ;;  %2024 = vmatprep.subr.bf16.mxu1 %v2400_v14  ;;  %v2235_v47 = vpack.c.bf16 %v570_v46, %v569_v45  ;;  %v677_v46 = vmul.f32 %v1862_v12, %v2502_v52  ;;  %s1830_s19 = sld [smem:[%s2719_s0 + %s2416_s16]]  }
 0x1cb   :  { %v375_v55 = vadd.f32 %v374_v53, %v302_v48  ;;  %v2017_v56 = vpop.f32.mrb[7].mxu1  ;;  %v388_v59 = vmax.f32 %v372_v50, 0.0  ;;  %v1856_v48 = vld [vmem:[%s1822_s20] ss:$0 sm:$0xff]  ;;  %s2417_s20 = smov 23   ;;  %s1842_s16 = sld [smem:[%s2719_s0 + %s2403_s26]]  }
 0x1cc   :  { %2236 = vmatprep.subr.bf16.mxu0 %v2235_v47  ;;  %v1859_v56 = vld [vmem:[%s1824_s24] ss:$0 sm:$0xff]  ;;  %s2634_s23 = sld [smem:[%s2719_s0 + %s2417_s20]]   ;;  %s2418_s24 = smov 21  }
 0x1cd   :  { %v389_v60 = vmax.f32 %v375_v55, 0.0  ;;  %2238 = vmatpush3.bf16.msra.mxu0 %v2235_v47  ;;  %s1831_s28 = sld [smem:[%s2719_s0 + %s2418_s24]]  }
 0x1ce   :  { %2062 = vmatprep.subr.bf16.mxu0 %v2400_v14 }
 0x1cf   :  { %v393_v61 = vpack.c.bf16 %v389_v60, %v388_v59 }
 0x1d0   :  { %v379_v63 = vpop.f32.mrb[8].mxu1 }
 0x1d1   :  { %v380_v0 = vadd.f32 %v379_v63, %v303_v62  ;;  %v2020_v1 = vpop.f32.mrb[9].mxu1  ;;  %2025 = vmatpush3.bf16.msra.mxu1 %v393_v61 }
 0x1d2   :  { %v382_v3 = vpop.f32.mrb[10].mxu1  ;;  %2026 = vmatprep.subr.bf16.mxu1 %v2400_v14 }
 0x1d3   :  { %v383_v4 = vadd.f32 %v382_v3, %v304_v2  ;;  %v2021_v5 = vpop.f32.mrb[11].mxu1  ;;  %v390_v8 = vmax.f32 %v380_v0, 0.0  ;;  %v811_v3 = vld [vmem:[%s2570_s29] sm:$0xff] }
 0x1d4   :  { %v813_v5 = vld [vmem:[%s2570_s29 + $0x10] sm:$0xff] }
 0x1d5   :  { %v391_v9 = vmax.f32 %v383_v4, 0.0  ;;  %v812_v4 = vld [vmem:[%s2570_s29 + $0x8] sm:$0xff] }
 0x1d6   :  { %v2239_v6 = vpack.c.bf16 %v812_v4, %v811_v3  ;;  %v818_v3 = vld [vmem:[%s2570_s29 + $0x38] sm:$0xff] }
 0x1d7   :  { %v394_v11 = vpack.c.bf16 %v391_v9, %v390_v8  ;;  %v2243_v8 = vpack.c.bf16 %v814_v7, %v813_v5  ;;  %v815_v9 = vld [vmem:[%s2570_s29 + $0x20] sm:$0xff] }
 0x1d8   :  { %v909_v5 = vld [vmem:[%s1829_s11] sm:$0xff] }
 0x1d9   :  { %2027 = vmatpush3.bf16.msra.mxu1 %v394_v11 }
 0x1da   :  { %2216 = vmatprep.subr.bf16.mxu1 %v2215_v10 }
 0x1dc   :  { %2029 = vmatmul.mubr.msk.bf16.vlgmr.msra.gmra.mrb[12].mxu1 %vm400_vm2, %v2520_v15 }
 0x1dd   :  { %2218 = vmatpush3.bf16.msra.mxu1 %v2215_v10  ;;  %v816_v10 = vld [vmem:[%s2570_s29 + $0x28] sm:$0xff] }
 0x1de   :  { %2220 = vmatprep.subr.bf16.mxu1 %v2219_v16  ;;  %v2247_v11 = vpack.c.bf16 %v816_v10, %v815_v9 }
 0x1e1   :  { %2222 = vmatpush3.bf16.msra.mxu1 %v2219_v16  ;;  %v1863_v16 = vld [vmem:[%s1826_s7] ss:$0 sm:$0xff]  ;;  %s2421_s7 = smov 24  }
 0x1e2   :  { %2224 = vmatprep.subr.bf16.mxu1 %v2223_v19  ;;  %v686_v18 = vadd.f32 %v1863_v16, %v673_v13  ;;  %s1834_s10 = sld [smem:[%s2719_s0 + %s2421_s7]]  }
 0x1e5   :  { %2226 = vmatpush3.bf16.msra.mxu1 %v2223_v19 }
 0x1e6   :  { %2228 = vmatprep.subr.bf16.mxu1 %v2227_v22 }
 0x1e9   :  { %2230 = vmatpush3.bf16.msra.mxu1 %v2227_v22  ;;  %v687_v22 = vadd.f32 %v1863_v16, %v674_v17 }
 0x1ea   :  { %2076 = vmatprep.subr.bf16.mxu1 %v2400_v14 }
 0x2af   :  { %v438_v34 = vpop.f32.mrb[12].mxu1 }
 0x2b0   :  { %v455_v35 = vmul.f32 %v2532_v31, %v438_v34  ;;  %v2030_v36 = vpop.f32.mrb[13].mxu1 }
 0x2b1   :  { %v441_v38 = vpop.f32.mrb[14].mxu1 }
 0x2b2   :  { %v456_v40 = vmul.f32 %v2534_v33, %v441_v38  ;;  %v2031_v41 = vpop.f32.mrb[15].mxu1  ;;  %v466_v42 = vsel %vm465_vm3, %v455_v35, %v460_v37  ;;  %v676_v35 = vmul.f32 %v1862_v12, %v2499_v39 }
 0x2b3   :  { %2048 = vmatprep.mubr.msk.f32.mxu1 %vm483_vm4, %v466_v42 }
 0x2b4   :  { %v467_v44 = vsel %vm465_vm3, %v456_v40, %v462_v43  ;;  %v688_v40 = vadd.f32 %v1863_v16, %v675_v28 }
 0x2b5   :  { %2049 = vmatmul.mubr.msk.f32.vlgmr.msra.gmra.mrb[16].mxu1 %vm483_vm4, %v467_v44  ;;  %v689_v44 = vadd.f32 %v1863_v16, %v676_v35 }
 0x2b6   :  { %2082 = vmatprep.mubr.msk.bf16.mxu1 %vm2401_vm1, %v2400_v14 }
 0x388   :  { %v2050_v49 = vpop.f32.mrb[16].mxu1 }
 0x389   :  { %v562_v50 = vadd.f32 %v2050_v49, %v1856_v48  ;;  %v556_v51 = vpop.f32.mrb[17].mxu1  ;;  %v678_v49 = vmul.f32 %v1862_v12, %v2511_v57 }
 0x38a   :  { %v557_v53 = vadd.f32 %v1856_v48, %v556_v51 }
 0x38b   :  { %v566_v55 = vmax.f32 %v562_v50, 0.0 }
 0x38c   :  { %v565_v54 = vmax.f32 %v557_v53, 0.0 }
 0x38e   :  { %2059 = vmatprep.mubr.msk.f32.mxu0 %vm465_vm3, %v565_v54  ;;  %v690_v54 = vadd.f32 %v1863_v16, %v677_v46 }
 0x38f   :  { %2060 = vmatmul.mubr.msk.f32.vlgmr.msra.gmra.mrb[2].mxu0 %vm465_vm3, %v566_v55 }
 0x390   :  { %2064 = vmatprep.mubr.msk.bf16.mxu0 %vm2401_vm1, %v2400_v14 }
 0x462   :  { %v2061_v58 = vpop.f32.mrb[2].mxu0 }
 0x463   :  { %v656_v59 = vadd.f32 %v2061_v58, %v1859_v56  ;;  %v650_v60 = vpop.f32.mrb[3].mxu0 }
 0x464   :  { %v651_v61 = vadd.f32 %v1859_v56, %v650_v60 }
 0x465   :  { %v662_v62 = vmul.f32 0.01, %v656_v59  ;;  %vm660_vm5 = vcmp.ge.f32.partialorder %v656_v59, 0.0 }
 0x466   :  { %v661_v63 = vmul.f32 0.01, %v651_v61  ;;  %vm659_vm6 = vcmp.ge.f32.partialorder %v651_v61, 0.0 }
 0x467   :  { %v664_v0 = vsel %vm660_vm5, %v656_v59, %v662_v62  ;;  %v691_v59 = vadd.f32 %v1863_v16, %v678_v49  ;;  %v1155_v49 = vld [vmem:[%s2634_s23 + $0x10] sm:$0xff] }
 0x468   :  { %805 = vrot.lane.b32.xlu1 %v664_v0, %s2403_s26  ;;  %v663_v1 = vsel %vm659_vm6, %v651_v61, %v661_v63 }
 0x469   :  { %803 = vrot.lane.b32.xlu0 %v663_v1, %s2403_s26  ;;  %v665_v2 = vpack.c.bf16 %v664_v0, %v663_v1 }
 0x46b   :  { %2063 = vmatpush3.bf16.msra.mxu0 %v665_v2  ;;  %v817_v2 = vld [vmem:[%s2570_s29 + $0x30] sm:$0xff]  ;;  %s2419_s29 = smov 22  }
 0x46c   :  { %2240 = vmatprep.subr.bf16.mxu0 %v2239_v6  ;;  %v2251_v4 = vpack.c.bf16 %v818_v3, %v817_v2  ;;  %s1832_s2 = sld [smem:[%s2719_s0 + %s2419_s29]]  }
 0x46e   :  { %2065 = vmatmul.mubr.msk.bf16.vlgmr.msra.gmra.mrb[4].mxu0 %vm164_vm0, %v2460_v23 }
 0x46f   :  { %2068 = vmatprep.mubr.msk.bf16.mxu0 %vm2401_vm1, %v2400_v14  ;;  %2242 = vmatpush3.bf16.msra.mxu0 %v2239_v6  ;;  %v910_v6 = vld [vmem:[%s1829_s11 + $0x8] sm:$0xff] }
 0x470   :  { %2244 = vmatprep.subr.bf16.mxu0 %v2243_v8  ;;  %v2255_v7 = vpack.c.bf16 %v910_v6, %v909_v5 }
 0x473   :  { %2246 = vmatpush3.bf16.msra.mxu0 %v2243_v8 }
 0x474   :  { %2248 = vmatprep.subr.bf16.mxu0 %v2247_v11 }
 0x476   :  { %2069 = vmatmul.mubr.msk.bf16.gmra.mrb[8].mxu0 %vm164_vm0, %v2467_v24 }
 0x477   :  { %2072 = vmatprep.mubr.msk.bf16.mxu0 %vm2401_vm1, %v2400_v14  ;;  %2250 = vmatpush3.bf16.msra.mxu0 %v2247_v11 }
 0x478   :  { %2252 = vmatprep.subr.bf16.mxu0 %v2251_v4 }
 0x47b   :  { %2254 = vmatpush3.bf16.msra.mxu0 %v2251_v4 }
 0x47c   :  { %2130 = vmatprep.subr.bf16.mxu0 %v2400_v14 }
 0x47e   :  { %2073 = vmatmul.mubr.msk.bf16.gmra.mrb[12].mxu0 %vm164_vm0, %v2473_v25 }
 0x4db   :  { %v804_v11 = vpop.permute.xlu0 %803 }
 0x541   :  { %v726_v19 = vpop.f32.mrb[4].mxu0 }
 0x542   :  { %v727_v20 = vadd.f32 %v726_v19, %v686_v18  ;;  %v2066_v21 = vpop.f32.mrb[5].mxu0  ;;  %v806_v18 = vpop.permute.xlu1 %805 }
 0x543   :  { %v729_v27 = vpop.f32.mrb[6].mxu0  ;;  %v912_v21 = vld [vmem:[%s1829_s11 + $0x18] sm:$0xff] }
 0x544   :  { %v730_v30 = vadd.f32 %v729_v27, %v687_v22  ;;  %v2067_v34 = vpop.f32.mrb[7].mxu0  ;;  %v749_v36 = vmax.f32 %v727_v20, 0.0  ;;  %v911_v20 = vld [vmem:[%s1829_s11 + $0x10] sm:$0xff]  ;;  %v1868_v27 = vld [vmem:[%s1828_s15] ss:$0 sm:$0xff]  ;;  %s2422_s11 = smov 27  }
 0x545   :  { %v2259_v22 = vpack.c.bf16 %v912_v21, %v911_v20  ;;  %s1837_s14 = sld [smem:[%s2719_s0 + %s2422_s11]]   ;;  %s2423_s15 = smov 26  }
 0x546   :  { %v750_v37 = vmax.f32 %v730_v30, 0.0  ;;  %s1836_s18 = sld [smem:[%s2719_s0 + %s2423_s15]]  }
 0x548   :  { %v755_v38 = vpack.c.bf16 %v750_v37, %v749_v36 }
 0x549   :  { %v734_v41 = vpop.f32.mrb[8].mxu0 }
 0x54a   :  { %v735_v42 = vadd.f32 %v734_v41, %v688_v40  ;;  %v2070_v43 = vpop.f32.mrb[9].mxu0  ;;  %2077 = vmatpush3.bf16.msra.mxu1 %v755_v38  ;;  %v1871_v38 = vld [vmem:[%s1830_s19] ss:$0 sm:$0xff]  ;;  %s2424_s19 = smov 29  }
 0x54b   :  { %v737_v45 = vpop.f32.mrb[10].mxu0  ;;  %2078 = vmatprep.subr.bf16.mxu1 %v2400_v14  ;;  %s1839_s22 = sld [smem:[%s2719_s0 + %s2424_s19]]  }
 0x54c   :  { %v738_v47 = vadd.f32 %v737_v45, %v689_v44  ;;  %v2071_v48 = vpop.f32.mrb[11].mxu0  ;;  %v751_v50 = vmax.f32 %v735_v42, 0.0 }
 0x54e   :  { %v752_v51 = vmax.f32 %v738_v47, 0.0 }
 0x550   :  { %v756_v53 = vpack.c.bf16 %v752_v51, %v751_v50  ;;  %v1156_v51 = vld [vmem:[%s2634_s23 + $0x18] sm:$0xff] }
 0x551   :  { %v742_v55 = vpop.f32.mrb[12].mxu0 }
 0x552   :  { %v743_v56 = vadd.f32 %v742_v55, %v690_v54  ;;  %v2074_v58 = vpop.f32.mrb[13].mxu0  ;;  %2079 = vmatpush3.bf16.msra.mxu1 %v756_v53  ;;  %v2267_v53 = vpack.c.bf16 %v1156_v51, %v1155_v49  ;;  %v1157_v54 = vld [vmem:[%s2634_s23 + $0x20] sm:$0xff]  ;;  %v1252_v49 = vld [vmem:[%s1835_s6 + $0x8] sm:$0xff] }
 0x553   :  { %v745_v60 = vpop.f32.mrb[14].mxu0  ;;  %2080 = vmatprep.subr.bf16.mxu1 %v2400_v14 }
 0x554   :  { %v746_v61 = vadd.f32 %v745_v60, %v691_v59  ;;  %v2075_v62 = vpop.f32.mrb[15].mxu0  ;;  %v753_v63 = vmax.f32 %v743_v56, 0.0  ;;  %v1874_v56 = vld [vmem:[%s1831_s28] ss:$0 sm:$0xff]  ;;  %s2426_s28 = smov 28  }
 0x555   :  { %v1015_v58 = vmul.f32 %v1874_v56, %v2490_v26  ;;  %v1875_v59 = vld [vmem:[%s1832_s2] ss:$0 sm:$0xff]  ;;  %v1016_v60 = vmul.f32 %v1874_v56, %v2493_v29  ;;  %v1017_v3 = vmul.f32 %v1874_v56, %v2496_v32  ;;  %v1018_v6 = vmul.f32 %v1874_v56, %v2499_v39  ;;  %s1838_s1 = sld [smem:[%s2719_s0 + %s2426_s28]]   ;;  %s2427_s2 = smov 2  }
 0x556   :  { %v754_v0 = vmax.f32 %v746_v61, 0.0  ;;  %s1812_s5 = sld [smem:[%s2719_s0 + %s2427_s2]]  }
 0x557   :  { %v1028_v61 = vadd.f32 %v1875_v59, %v1015_v58  ;;  %v1031_v29 = vadd.f32 %v1875_v59, %v1018_v6  ;;  %v1347_v58 = vld [vmem:[%s1837_s14] sm:$0xff] }
 0x558   :  { %v757_v1 = vpack.c.bf16 %v754_v0, %v753_v63  ;;  %v1443_v6 = vld [vmem:[%s1839_s22] sm:$0xff] }
 0x55a   :  { %2081 = vmatpush3.bf16.msra.mxu1 %v757_v1  ;;  %v1029_v1 = vadd.f32 %v1875_v59, %v1016_v60 }
 0x55b   :  { %2256 = vmatprep.subr.bf16.mxu1 %v2255_v7 }
 0x55d   :  { %2083 = vmatmul.mubr.msk.bf16.vlgmr.msra.gmra.mrb[20].mxu1 %vm400_vm2, %v2520_v15 }
 0x55e   :  { %2258 = vmatpush3.bf16.msra.mxu1 %v2255_v7 }
 0x55f   :  { %2260 = vmatprep.subr.bf16.mxu1 %v2259_v22 }
 0x562   :  { %2262 = vmatpush3.bf16.msra.mxu1 %v2259_v22 }
 0x563   :  { %2116 = vmatprep.subr.bf16.mxu1 %v2400_v14 }
 0x630   :  { %v792_v8 = vpop.f32.mrb[20].mxu1 }
 0x631   :  { %v799_v9 = vmul.f32 %v792_v8, %v2532_v31  ;;  %v2084_v10 = vpop.f32.mrb[21].mxu1 }
 0x632   :  { %v795_v12 = vpop.f32.mrb[22].mxu1  ;;  %v1030_v10 = vadd.f32 %v1875_v59, %v1017_v3 }
 0x633   :  { %v800_v13 = vmul.f32 %v795_v12, %v2534_v33  ;;  %v2085_v16 = vpop.f32.mrb[23].mxu1  ;;  %v809_v17 = vsel %vm465_vm3, %v799_v9, %v804_v11 }
 0x634   :  { %2102 = vmatprep.mubr.msk.f32.mxu0 %vm483_vm4, %v809_v17  ;;  %v1019_v16 = vmul.f32 %v1874_v56, %v2502_v52 }
 0x635   :  { %v810_v19 = vsel %vm465_vm3, %v800_v13, %v806_v18  ;;  %v1020_v18 = vmul.f32 %v1874_v56, %v2511_v57  ;;  %v1159_v57 = vld [vmem:[%s2634_s23 + $0x30] sm:$0xff] }
 0x636   :  { %2103 = vmatmul.mubr.msk.f32.vlgmr.msra.gmra.mrb[16].mxu0 %vm483_vm4, %v810_v19  ;;  %v1032_v21 = vadd.f32 %v1875_v59, %v1019_v16 }
 0x637   :  { %2136 = vmatprep.mubr.msk.bf16.mxu0 %vm2401_vm1, %v2400_v14 }
 0x709   :  { %v2104_v28 = vpop.f32.mrb[16].mxu0 }
 0x70a   :  { %v904_v30 = vadd.f32 %v2104_v28, %v1868_v27  ;;  %v898_v34 = vpop.f32.mrb[17].mxu0 }
 0x70b   :  { %v899_v35 = vadd.f32 %v1868_v27, %v898_v34 }
 0x70c   :  { %v908_v37 = vmax.f32 %v904_v30, 0.0  ;;  %v1033_v30 = vadd.f32 %v1875_v59, %v1020_v18  ;;  %v1348_v59 = vld [vmem:[%s1837_s14 + $0x8] sm:$0xff] }
 0x70d   :  { %v907_v36 = vmax.f32 %v899_v35, 0.0  ;;  %v2283_v60 = vpack.c.bf16 %v1348_v59, %v1347_v58 }
 0x70f   :  { %2113 = vmatprep.mubr.msk.f32.mxu1 %vm465_vm3, %v907_v36 }
 0x710   :  { %2114 = vmatmul.mubr.msk.f32.vlgmr.msra.gmra.mrb[18].mxu1 %vm465_vm3, %v908_v37 }
 0x711   :  { %2118 = vmatprep.mubr.msk.bf16.mxu1 %vm2401_vm1, %v2400_v14 }
 0x7e3   :  { %v2115_v40 = vpop.f32.mrb[18].mxu1 }
 0x7e4   :  { %v998_v41 = vadd.f32 %v2115_v40, %v1871_v38  ;;  %v992_v42 = vpop.f32.mrb[19].mxu1  ;;  %v1160_v40 = vld [vmem:[%s2634_s23 + $0x38] sm:$0xff] }
 0x7e5   :  { %v993_v43 = vadd.f32 %v1871_v38, %v992_v42 }
 0x7e6   :  { %v1004_v44 = vmul.f32 0.01, %v998_v41  ;;  %vm1002_vm7 = vcmp.ge.f32.partialorder %v998_v41, 0.0 }
 0x7e7   :  { %v1003_v45 = vmul.f32 0.01, %v993_v43  ;;  %vm1001_vm8 = vcmp.ge.f32.partialorder %v993_v43, 0.0 }
 0x7e8   :  { %v1006_v46 = vsel %vm1002_vm7, %v998_v41, %v1004_v44  ;;  %v2275_v41 = vpack.c.bf16 %v1160_v40, %v1159_v57  ;;  %v2344_v57 = vld [vmem:[%s1812_s5] sm:$0xff]   ;;  %v2345_v40 = vld [vmem:[%s1812_s5 + $0x8] sm:$0xff]  }
 0x7e9   :  { %1147 = vrot.lane.b32.xlu1 %v1006_v46, %s2403_s26  ;;  %v1005_v47 = vsel %vm1001_vm8, %v993_v43, %v1003_v45 }
 0x7ea   :  { %1145 = vrot.lane.b32.xlu0 %v1005_v47, %s2403_s26  ;;  %v1007_v48 = vpack.c.bf16 %v1006_v46, %v1005_v47 }
 0x7ec   :  { %2117 = vmatpush3.bf16.msra.mxu1 %v1007_v48 }
 0x7ef   :  { %2119 = vmatmul.mubr.msk.bf16.vlgmr.msra.gmra.mrb[24].mxu1 %vm164_vm0, %v2460_v23  ;;  %v1153_v23 = vld [vmem:[%s2634_s23] sm:$0xff] }
 0x7f0   :  { %2122 = vmatprep.mubr.msk.bf16.mxu1 %vm2401_vm1, %v2400_v14 }
 0x7f7   :  { %2123 = vmatmul.mubr.msk.bf16.gmra.mrb[28].mxu1 %vm164_vm0, %v2467_v24  ;;  %v1154_v24 = vld [vmem:[%s2634_s23 + $0x8] sm:$0xff] }
 0x7f8   :  { %2126 = vmatprep.mubr.msk.bf16.mxu1 %vm2401_vm1, %v2400_v14  ;;  %v2263_v50 = vpack.c.bf16 %v1154_v24, %v1153_v23 }
 0x7fa   :  { %2264 = vmatprep.subr.bf16.mxu1 %v2263_v50 }
 0x7fb   :  { %2266 = vmatpush3.bf16.msra.mxu1 %v2263_v50 }
 0x7fc   :  { %2268 = vmatprep.subr.bf16.mxu1 %v2267_v53 }
 0x7ff   :  { %2127 = vmatmul.mubr.msk.bf16.gmra.mrb[32].mxu1 %vm164_vm0, %v2473_v25  ;;  %v1158_v25 = vld [vmem:[%s2634_s23 + $0x28] sm:$0xff]  ;;  %s2425_s23 = smov 30  }
 0x800   :  { %v2271_v55 = vpack.c.bf16 %v1158_v25, %v1157_v54  ;;  %2270 = vmatpush3.bf16.msra.mxu1 %v2267_v53  ;;  %s1840_s27 = sld [smem:[%s2719_s0 + %s2425_s23]]  }
 0x802   :  { %2272 = vmatprep.subr.bf16.mxu1 %v2271_v55 }
 0x804   :  { %2274 = vmatpush3.bf16.msra.mxu1 %v2271_v55 }
 0x805   :  { %2276 = vmatprep.subr.bf16.mxu1 %v2275_v41 }
 0x806   :  { %v1531_v16 = vld [vmem:[%s1840_s27 + $0x18] sm:$0xff] }
 0x808   :  { %2278 = vmatpush3.bf16.msra.mxu1 %v2275_v41  ;;  %v2346_v41 = vld [vmem:[%s1812_s5 + $0x10] sm:$0xff]  }
 0x85b   :  { %v1148_v24 = vpop.permute.xlu1 %1147 }
 0x85c   :  { %v1146_v45 = vpop.permute.xlu0 %1145 }
 0x8c2   :  { %v1068_v62 = vpop.f32.mrb[24].mxu1 }
 0x8c3   :  { %v1069_v63 = vadd.f32 %v1068_v62, %v1028_v61  ;;  %v2120_v0 = vpop.f32.mrb[25].mxu1  ;;  %v1883_v61 = vld [vmem:[%s1836_s18] ss:$0 sm:$0xff] }
 0x8c4   :  { %v1071_v2 = vpop.f32.mrb[26].mxu1 }
 0x8c5   :  { %v1072_v4 = vadd.f32 %v1071_v2, %v1029_v1  ;;  %v2121_v5 = vpop.f32.mrb[27].mxu1  ;;  %v1091_v7 = vmax.f32 %v1069_v63, 0.0 }
 0x8c7   :  { %v1092_v8 = vmax.f32 %v1072_v4, 0.0 }
 0x8c9   :  { %v1097_v9 = vpack.c.bf16 %v1092_v8, %v1091_v7  ;;  %v1444_v7 = vld [vmem:[%s1839_s22 + $0x8] sm:$0xff]  ;;  %v1528_v8 = vld [vmem:[%s1840_s27] sm:$0xff] }
 0x8ca   :  { %v1076_v26 = vpop.f32.mrb[28].mxu1 }
 0x8cb   :  { %v1077_v11 = vadd.f32 %v1076_v26, %v1030_v10  ;;  %v2124_v12 = vpop.f32.mrb[29].mxu1  ;;  %2131 = vmatpush3.bf16.msra.mxu0 %v1097_v9  ;;  %v2287_v9 = vpack.c.bf16 %v1444_v7, %v1443_v6  ;;  %v1529_v10 = vld [vmem:[%s1840_s27 + $0x8] sm:$0xff] }
 0x8cc   :  { %v1079_v13 = vpop.f32.mrb[30].mxu1  ;;  %2132 = vmatprep.subr.bf16.mxu0 %v2400_v14  ;;  %v2295_v26 = vpack.c.bf16 %v1529_v10, %v1528_v8  ;;  %v1446_v12 = vld [vmem:[%s1839_s22 + $0x18] sm:$0xff] }
 0x8cd   :  { %v1080_v17 = vadd.f32 %v1079_v13, %v1031_v29  ;;  %v2125_v32 = vpop.f32.mrb[31].mxu1  ;;  %v1093_v19 = vmax.f32 %v1077_v11, 0.0  ;;  %v1445_v11 = vld [vmem:[%s1839_s22 + $0x10] sm:$0xff] }
 0x8ce   :  { %2296 = vmatprep.subr.bf16.mxu1 %v2295_v26  ;;  %v1530_v29 = vld [vmem:[%s1840_s27 + $0x10] sm:$0xff]  ;;  %v2291_v13 = vpack.c.bf16 %v1446_v12, %v1445_v11  ;;  %v1886_v32 = vld [vmem:[%s1838_s1] ss:$0 sm:$0xff] }
 0x8cf   :  { %v1094_v39 = vmax.f32 %v1080_v17, 0.0  ;;  %v2299_v17 = vpack.c.bf16 %v1531_v16, %v1530_v29 }
 0x8d1   :  { %v1098_v20 = vpack.c.bf16 %v1094_v39, %v1093_v19 }
 0x8d2   :  { %v1084_v22 = vpop.f32.mrb[32].mxu1 }
 0x8d3   :  { %v1085_v27 = vadd.f32 %v1084_v22, %v1032_v21  ;;  %v2128_v28 = vpop.f32.mrb[33].mxu1  ;;  %2133 = vmatpush3.bf16.msra.mxu0 %v1098_v20 }
 0x8d4   :  { %v1087_v34 = vpop.f32.mrb[34].mxu1  ;;  %2134 = vmatprep.subr.bf16.mxu0 %v2400_v14 }
 0x8d5   :  { %v1088_v35 = vadd.f32 %v1087_v34, %v1033_v30  ;;  %v2129_v52 = vpop.f32.mrb[35].mxu1  ;;  %v1095_v36 = vmax.f32 %v1085_v27, 0.0 }
 0x8d7   :  { %v1096_v37 = vmax.f32 %v1088_v35, 0.0 }
 0x8d9   :  { %v1099_v38 = vpack.c.bf16 %v1096_v37, %v1095_v36 }
 0x8db   :  { %2135 = vmatpush3.bf16.msra.mxu0 %v1099_v38 }
 0x8de   :  { %2137 = vmatmul.mubr.msk.bf16.vlgmr.msra.gmra.mrb[20].mxu0 %vm400_vm2, %v2520_v15 }
 0x9b1   :  { %v1134_v42 = vpop.f32.mrb[20].mxu0 }
 0x9b2   :  { %v1141_v43 = vmul.f32 %v1134_v42, %v2532_v31  ;;  %v2138_v44 = vpop.f32.mrb[21].mxu0  ;;  %v1251_v31 = vld [vmem:[%s1835_s6] sm:$0xff]  ;;  %s2428_s6 = smov 31  }
 0x9b3   :  { %v1137_v46 = vpop.f32.mrb[22].mxu0  ;;  %v2279_v50 = vpack.c.bf16 %v1252_v49, %v1251_v31  ;;  %s1841_s9 = sld [smem:[%s2719_s0 + %s2428_s6]]  }
 0x9b4   :  { %v1142_v47 = vmul.f32 %v1137_v46, %v2534_v33  ;;  %v1151_v48 = vsel %vm465_vm3, %v1141_v43, %v1146_v45  ;;  %v2139_v23 = vpop.f32.mrb[23].mxu0  ;;  %v1880_v33 = vld [vmem:[%s1834_s10] ss:$0 sm:$0xff]  ;;  %s2429_s10 = smov 6  }
 0x9b5   :  { %2156 = vmatprep.mubr.msk.f32.mxu1 %vm483_vm4, %v1151_v48  ;;  %2280 = vmatprep.subr.bf16.mxu0 %v2279_v50  ;;  %s1816_s13 = sld [smem:[%s2719_s0 + %s2429_s10]]  }
 0x9b6   :  { %v1152_v15 = vsel %vm465_vm3, %v1142_v47, %v1148_v24  ;;  %2282 = vmatpush3.bf16.msra.mxu0 %v2279_v50 }
 0x9b7   :  { %2157 = vmatmul.mubr.msk.f32.vlgmr.msra.gmra.mrb[36].mxu1 %vm483_vm4, %v1152_v15  ;;  %2284 = vmatprep.subr.bf16.mxu0 %v2283_v60 }
 0x9b8   :  { %2298 = vmatpush3.bf16.msra.mxu1 %v2295_v26 }
 0x9b9   :  { %2300 = vmatprep.subr.bf16.mxu1 %v2299_v17  ;;  %v70_v30 = vstv %s1841_s9 }
 0x9ba   :  { %71 = vst [vmem:[#allocation2] sm:$0x1] %v70_v30 }
 0x9bb   :  { %v1703_v42 = vld [vmem:[%s1816_s13] sm:$0xff]  ;;  %v1704_v44 = vld [vmem:[%s1816_s13 + $0x8] sm:$0xff]  ;;  %v1705_v46 = vld [vmem:[%s1816_s13 + $0x10] sm:$0xff] }
 0x9bc   :  { %2302 = vmatpush3.bf16.msra.mxu1 %v2299_v17  ;;  %v1721_v43 = vsub.f32 1.0, %v1703_v42  ;;  %2347 = vlog2.f32 %v1703_v42  ;;  %v1722_v45 = vsub.f32 1.0, %v1704_v44  ;;  %v1706_v47 = vld [vmem:[%s1816_s13 + $0x18] sm:$0xff]  ;;  %v1723_v48 = vsub.f32 1.0, %v1705_v46  ;;  %v1707_v24 = vld [vmem:[%s1816_s13 + $0x20] sm:$0xff]  ;;  %v1708_v31 = vld [vmem:[%s1816_s13 + $0x28] sm:$0xff] }
 0x9bd   :  { %v1725_v49 = vsub.f32 1.0, %v1707_v24 }
 0x9be   :  { %2349 = vlog2.f32 %v1721_v43 }
 0x9bf   :  { %2351 = vlog2.f32 %v1704_v44 }
 0x9c0   :  { %2353 = vlog2.f32 %v1722_v45 }
 0x9c1   :  { %2355 = vlog2.f32 %v1705_v46 }
 0x9c2   :  { %2357 = vlog2.f32 %v1723_v48 }
 0x9c3   :  { %2359 = vlog2.f32 %v1706_v47 }
 0x9c6   :  { %v2348_v23 = vpop.eup %2347 }
 0x9c7   :  { %v1710_v50 = vmul.f32 0.6931472, %v2348_v23 }
 0x9c8   :  { %v2350_v15 = vpop.eup %2349 }
 0xa8a   :  { %v2158_v51 = vpop.f32.mrb[36].mxu1 }
 0xa8b   :  { %v1246_v53 = vadd.f32 %v2158_v51, %v1880_v33  ;;  %v1240_v54 = vpop.f32.mrb[37].mxu1  ;;  %v2352_v51 = vpop.eup %2351 }
 0xa8c   :  { %v1241_v25 = vadd.f32 %v1880_v33, %v1240_v54  ;;  %v1728_v33 = vmul.f32 0.6931472, %v2350_v15  ;;  %v2354_v54 = vpop.eup %2353 }
 0xa8d   :  { %v1250_v56 = vmax.f32 %v1246_v53, 0.0  ;;  %v1726_v53 = vsub.f32 1.0, %v1708_v31 }
 0xa8e   :  { %v1249_v55 = vmax.f32 %v1241_v25, 0.0  ;;  %v1893_v25 = vld [vmem:[#allocation2] ss:$0 sm:$0xff] }
 0xa90   :  { %2163 = vmatprep.mubr.msk.f32.mxu0 %vm164_vm0, %v1249_v55  ;;  %v2356_v55 = vpop.eup %2355 }
 0xa91   :  { %2164 = vmatmul.mubr.msk.f32.vlgmr.msra.gmra.mrb[18].mxu0 %vm164_vm0, %v1250_v56  ;;  %v1739_v56 = vsub.f32 %v1710_v50, %v1728_v33  ;;  %v2358_v58 = vpop.eup %2357 }
 0xa92   :  { %2286 = vmatpush3.bf16.msra.mxu0 %v2283_v60  ;;  %v1712_v60 = vmul.f32 0.6931472, %v2352_v51  ;;  %v1732_v6 = vmul.f32 0.6931472, %v2358_v58 }
 0xa93   :  { %2288 = vmatprep.subr.bf16.mxu0 %v2287_v9 }
 0xb64   :  { %v2165_v62 = vpop.f32.mrb[18].mxu0 }
 0xb65   :  { %v1338_v63 = vadd.f32 %v2165_v62, %v1883_v61  ;;  %v1332_v0 = vpop.f32.mrb[19].mxu0  ;;  %v2360_v62 = vpop.eup %2359 }
 0xb66   :  { %v1333_v1 = vadd.f32 %v1883_v61, %v1332_v0  ;;  %v1730_v61 = vmul.f32 0.6931472, %v2354_v54 }
 0xb67   :  { %v1344_v2 = vmul.f32 0.01, %v1338_v63  ;;  %vm1342_vm9 = vcmp.ge.f32.partialorder %v1338_v63, 0.0 }
 0xb68   :  { %vm1341_vm10 = vcmp.ge.f32.partialorder %v1333_v1, 0.0  ;;  %v1343_v3 = vmul.f32 0.01, %v1333_v1  ;;  %v1740_v8 = vsub.f32 %v1712_v60, %v1730_v61 }
 0xb69   :  { %v1346_v5 = vsel %vm1342_vm9, %v1338_v63, %v1344_v2 }
 0xb6a   :  { %v1345_v4 = vsel %vm1341_vm10, %v1333_v1, %v1343_v3 }
 0xb6b   :  { %2170 = vmatprep.mubr.msk.f32.mxu0 %vm164_vm0, %v1345_v4 }
 0xb6c   :  { %2171 = vmatmul.mubr.msk.f32.vlgmr.msra.gmra.mrb[24].mxu0 %vm164_vm0, %v1346_v5  ;;  %v1714_v5 = vmul.f32 0.6931472, %v2356_v55 }
 0xb6d   :  { %2290 = vmatpush3.bf16.msra.mxu0 %v2287_v9  ;;  %v1716_v9 = vmul.f32 0.6931472, %v2360_v62 }
 0xb6e   :  { %2292 = vmatprep.subr.bf16.mxu0 %v2291_v13  ;;  %v1741_v12 = vsub.f32 %v1714_v5, %v1732_v6 }
 0xb71   :  { %2294 = vmatpush3.bf16.msra.mxu0 %v2291_v13 }
 0xb72   :  { %2195 = vmatprep.subr.bf16.mxu0 %v2400_v14 }
 0xc3f   :  { %v2172_v18 = vpop.f32.mrb[24].mxu0 }
 0xc40   :  { %v1434_v19 = vadd.f32 %v2172_v18, %v1886_v32  ;;  %v1428_v39 = vpop.f32.mrb[25].mxu0 }
 0xc41   :  { %v1429_v20 = vadd.f32 %v1886_v32, %v1428_v39 }
 0xc42   :  { %v1440_v21 = vmul.f32 0.01, %v1434_v19  ;;  %vm1438_vm11 = vcmp.ge.f32.partialorder %v1434_v19, 0.0 }
 0xc43   :  { %vm1437_vm12 = vcmp.ge.f32.partialorder %v1429_v20, 0.0  ;;  %v1439_v22 = vmul.f32 0.01, %v1429_v20 }
 0xc44   :  { %v1442_v28 = vsel %vm1438_vm11, %v1434_v19, %v1440_v21 }
 0xc45   :  { %v1441_v27 = vsel %vm1437_vm12, %v1429_v20, %v1439_v22 }
 0xc46   :  { %2181 = vmatprep.mubr.msk.f32.mxu0 %vm465_vm3, %v1441_v27  ;;  %2192 = vmatprep.mubr.msk.f32.mxu1 %vm465_vm3, %v1441_v27 }
 0xc47   :  { %2182 = vmatmul.mubr.msk.f32.vlgmr.msra.gmra.mrb[26].mxu0 %vm465_vm3, %v1442_v28  ;;  %2193 = vmatmul.mubr.msk.f32.vlgmr.msra.gmra.mrb[38].mxu1 %vm465_vm3, %v1442_v28 }
 0xc48   :  { %2199 = vmatprep.mubr.msk.bf16.mxu0 %vm2401_vm1, %v2400_v14 }
 0xd1a   :  { %v2183_v34 = vpop.f32.mrb[26].mxu0  ;;  %v2194_v35 = vpop.f32.mrb[38].mxu1 }
 0xd1b   :  { %v1519_v52 = vpop.f32.mrb[27].mxu0  ;;  %v1598_v36 = vpop.f32.mrb[39].mxu1 }
 0xd1c   :  { %v1613_v37 = vpack.c.bf16 %v2183_v34, %v1519_v52  ;;  %v1614_v38 = vpack.c.bf16 %v2194_v35, %v1598_v36 }
 0xd1e   :  { %2196 = vmatpush3.bf16.msra.mxu0 %v1613_v37 }
 0xd1f   :  { %2197 = vmatprep.subr.bf16.mxu0 %v2400_v14 }
 0xd22   :  { %2198 = vmatpush3.bf16.msra.mxu0 %v1614_v38 }
 0xd25   :  { %2200 = vmatmul.mubr.msk.bf16.vlgmr.msra.gmra.mrb[28].mxu0 %vm465_vm3, %v2344_v57 }
 0xd26   :  { %2203 = vmatprep.mubr.msk.bf16.mxu0 %vm2401_vm1, %v2400_v14 }
 0xd2d   :  { %2204 = vmatmul.mubr.msk.bf16.gmra.mrb[32].mxu0 %vm465_vm3, %v2345_v40 }
 0xd2e   :  { %2207 = vmatprep.mubr.msk.bf16.mxu0 %vm2401_vm1, %v2400_v14  ;;  %v1724_v14 = vsub.f32 1.0, %v1706_v47 }
 0xd30   :  { %2361 = vlog2.f32 %v1724_v14 }
 0xd31   :  { %2363 = vlog2.f32 %v1707_v24 }
 0xd32   :  { %2365 = vlog2.f32 %v1725_v49 }
 0xd33   :  { %2367 = vlog2.f32 %v1708_v31 }
 0xd34   :  { %2369 = vlog2.f32 %v1726_v53 }
 0xd35   :  { %2208 = vmatmul.mubr.msk.bf16.gmra.mrb[36].mxu0 %vm465_vm3, %v2346_v41 }
 0xd3a   :  { %v2362_v1 = vpop.eup %2361 }
 0xd3b   :  { %v1734_v10 = vmul.f32 0.6931472, %v2362_v1  ;;  %v2364_v11 = vpop.eup %2363 }
 0xd3c   :  { %v2366_v29 = vpop.eup %2365  ;;  %v1718_v30 = vmul.f32 0.6931472, %v2364_v11 }
 0xd3d   :  { %v2368_v17 = vpop.eup %2367  ;;  %v1742_v19 = vsub.f32 %v1716_v9, %v1734_v10  ;;  %v1736_v34 = vmul.f32 0.6931472, %v2366_v29 }
 0xd3e   :  { %v2370_v39 = vpop.eup %2369  ;;  %v1720_v36 = vmul.f32 0.6931472, %v2368_v17 }
 0xd3f   :  { %v1738_v37 = vmul.f32 0.6931472, %v2370_v39  ;;  %v1743_v40 = vsub.f32 %v1718_v30, %v1736_v34 }
 0xd41   :  { %v1744_v46 = vsub.f32 %v1720_v36, %v1738_v37 }
 0xdf8   :  { %v1680_v59 = vpop.f32.mrb[28].mxu0 }
 0xdf9   :  { %v1681_v63 = vadd.f32 %v1893_v25, %v1680_v59  ;;  %v2201_v0 = vpop.f32.mrb[29].mxu0 }
 0xdfa   :  { %v1683_v2 = vpop.f32.mrb[30].mxu0 }
 0xdfb   :  { %v1745_v3 = vadd.f32 %v1739_v56, %v1681_v63  ;;  %v2202_v4 = vpop.f32.mrb[31].mxu0  ;;  %v1684_v7 = vadd.f32 %v1893_v25, %v1683_v2 }
 0xdfd   :  { %v1900_v26 = vmul.f32 -3.3333333, %v1745_v3  ;;  %v1746_v13 = vadd.f32 %v1740_v8, %v1684_v7 }
 0xdff   :  { %v1764_v20 = vmul.f32 1.442695, %v1900_v26  ;;  %v1901_v35 = vmul.f32 -3.3333333, %v1746_v13 }
 0xe00   :  { %v1688_v16 = vpop.f32.mrb[32].mxu0 }
 0xe01   :  { %v1689_v32 = vadd.f32 %v1893_v25, %v1688_v16  ;;  %v2205_v18 = vpop.f32.mrb[33].mxu0  ;;  %2371 = vpow2.f32 %v1764_v20  ;;  %v1766_v41 = vmul.f32 1.442695, %v1901_v35 }
 0xe02   :  { %v1691_v21 = vpop.f32.mrb[34].mxu0 }
 0xe03   :  { %v1747_v22 = vadd.f32 %v1741_v12, %v1689_v32  ;;  %v1692_v27 = vadd.f32 %v1893_v25, %v1691_v21  ;;  %v2206_v28 = vpop.f32.mrb[35].mxu0 }
 0xe05   :  { %v1748_v52 = vadd.f32 %v1742_v19, %v1692_v27  ;;  %v1902_v38 = vmul.f32 -3.3333333, %v1747_v22 }
 0xe07   :  { %v1903_v57 = vmul.f32 -3.3333333, %v1748_v52  ;;  %v1768_v47 = vmul.f32 1.442695, %v1902_v38 }
 0xe08   :  { %v1696_v42 = vpop.f32.mrb[36].mxu0 }
 0xe09   :  { %v1770_v43 = vmul.f32 1.442695, %v1903_v57  ;;  %v1697_v44 = vadd.f32 %v1893_v25, %v1696_v42  ;;  %v2209_v45 = vpop.f32.mrb[37].mxu0 }
 0xe0a   :  { %v1699_v48 = vpop.f32.mrb[38].mxu0 }
 0xe0b   :  { %2373 = vpow2.f32 %v1770_v43  ;;  %v1749_v14 = vadd.f32 %v1743_v40, %v1697_v44  ;;  %v1700_v23 = vadd.f32 %v1893_v25, %v1699_v48  ;;  %v2210_v24 = vpop.f32.mrb[39].mxu0  ;;  %v2372_v33 = vpop.eup %2371 }
 0xe0c   :  { %2375 = vpow2.f32 %v1766_v41  ;;  %v1776_v53 = vadd.f32 1.0, %v2372_v33 }
 0xe0d   :  { %v1904_v15 = vmul.f32 -3.3333333, %v1749_v14  ;;  %v1750_v31 = vadd.f32 %v1744_v46, %v1700_v23  ;;  %2377 = vpow2.f32 %v1768_v47 }
 0xe0f   :  { %v1772_v49 = vmul.f32 1.442695, %v1904_v15  ;;  %v1905_v50 = vmul.f32 -3.3333333, %v1750_v31 }
 0xe11   :  { %2379 = vpow2.f32 %v1772_v49  ;;  %v1774_v51 = vmul.f32 1.442695, %v1905_v50 }
 0xe13   :  { %2381 = vpow2.f32 %v1774_v51 }
 0xe14   :  { %2383 = vrcp.f32 %v1776_v53 }
 0xe15   :  { %v2374_v54 = vpop.eup %2373 }
 0xe16   :  { %v2376_v55 = vpop.eup %2375  ;;  %v1779_v56 = vadd.f32 1.0, %v2374_v54 }
 0xe17   :  { %v2378_v58 = vpop.eup %2377  ;;  %v1777_v59 = vadd.f32 1.0, %v2376_v55 }
 0xe18   :  { %2385 = vrcp.f32 %v1779_v56  ;;  %v1778_v60 = vadd.f32 1.0, %v2378_v58 }
 0xe19   :  { %2387 = vrcp.f32 %v1777_v59 }
 0xe1b   :  { %v2380_v25 = vpop.eup %2379 }
 0xe1c   :  { %v1780_v61 = vadd.f32 1.0, %v2380_v25 }
 0xe1d   :  { %v2382_v62 = vpop.eup %2381 }
 0xe1e   :  { %2389 = vrcp.f32 %v1780_v61  ;;  %v1781_v63 = vadd.f32 1.0, %v2382_v62  ;;  %v2384_v0 = vpop.eup %2383 }
 0xe1f   :  { %2391 = vrcp.f32 %v1778_v60 }
 0xe20   :  { %2393 = vrcp.f32 %v1781_v63 }
 0xe22   :  { %v2386_v1 = vpop.eup %2385 }
 0xe23   :  { %v1794_v2 = vadd.f32 %v2386_v1, %v2384_v0  ;;  %v2388_v4 = vpop.eup %2387 }
 0xe25   :  { %v1797_v3 = vmul.f32 0.5, %v1794_v2 }
 0xe27   :  { %1801 = vst.msk [vmem:[%s1842_s16] sm:$0xff] %vm1800_vm13, %v1797_v3  ;;  %1804 = vst.msk [vmem:[%s1842_s16 + $0x18] sm:$0xff] %vm1800_vm13, %v1797_v3 }
 0xe28   :  { %v2390_v5 = vpop.eup %2389 }
 0xe29   :  { %v2392_v6 = vpop.eup %2391  ;;  %v1795_v7 = vadd.f32 %v2390_v5, %v2388_v4 }
 0xe2a   :  { %v2394_v8 = vpop.eup %2393 }
 0xe2b   :  { %v1798_v9 = vmul.f32 0.5, %v1795_v7  ;;  %v1796_v10 = vadd.f32 %v2394_v8, %v2392_v6 }
 0xe2d   :  { %1802 = vst.msk [vmem:[%s1842_s16 + $0x8] sm:$0xff] %vm1800_vm13, %v1798_v9  ;;  %1805 = vst.msk [vmem:[%s1842_s16 + $0x20] sm:$0xff] %vm1800_vm13, %v1798_v9  ;;  %v1799_v26 = vmul.f32 0.5, %v1796_v10 }
 0xe2f   :  { %1803 = vst.msk [vmem:[%s1842_s16 + $0x10] sm:$0xff] %vm1800_vm13, %v1799_v26  ;;  %1806 = vst.msk [vmem:[%s1842_s16 + $0x28] sm:$0xff] %vm1800_vm13, %v1799_v26 }

</bundles_post_ra>
